<compile_context>
chip_gen: v7x
topology: tpu7x:2x2x1
jax: 0.10.0
libtpu: 0.0.40
codegen_flags: <defaults>
</compile_context>

<pallas_src>
import functools
import math

import jax
import jax.numpy as jnp
from jax.experimental import pallas as pl
from jax.experimental.pallas import tpu as pltpu

# ----------------------------- model config ---------------------------------
VOCAB = 100
HIDDEN = 32
INTER = 64
N_HEADS = 4
HEAD_DIM = HIDDEN // N_HEADS
N_LAYERS = 2
MAX_POS = 32
LAYER_INDICES = [0, 1, 2]      # embedding output + both encoder layers (scalar mix)
LN_EPS = 1e-12

# Storage dtype of the big weight matrices fed to the MXU (f32 accumulation is
# kept everywhere).  bf16 halves weight VMEM residency / DMA bytes, which is the
# lever that matters when this is scaled to real BERT dims (esp. v7x's 64 MiB
# VMEM).  Set to jnp.float32 for bit-parity with an all-f32 reference.
MATMUL_WEIGHT_DTYPE = jnp.bfloat16


# --------------------------- fused Pallas kernel -----------------------------
def _layer_norm(x, g, b):
    mu = jnp.mean(x, axis=-1, keepdims=True)
    var = jnp.mean((x - mu) ** 2, axis=-1, keepdims=True)
    return (x - mu) * jax.lax.rsqrt(var + LN_EPS) * g + b


def bert_fused_kernel(mix_ref, ntok_ref,                          # SMEM
                      emb_ref, amask_ref, sidx_ref, eidx_ref,     # per-batch blocks
                      embg_ref, embb_ref,
                      wqkv_ref, bqkv_ref, wo_ref, bo_ref, ln1g_ref, ln1b_ref,
                      wi_ref, bi_ref, wo2_ref, bo2_ref, ln2g_ref, ln2b_ref,
                      out_ref, *, n_layers, n_heads, head_dim, seq, t_max):
    b = pl.program_id(0)                       # grid axis = batch ("parallel")
    H = n_heads * head_dim
    wdt = wqkv_ref.dtype                       # MXU weight dtype (bf16 or f32)

    # hidden_states[0]: embedding sum -> LayerNorm (fused; saves an HBM pass)
    h = _layer_norm(emb_ref[0], embg_ref[...], embb_ref[...])     # (S, H) f32
    mixed = mix_ref[0] * h                                        # scalar mix, on the fly

    amask = amask_ref[0]                                          # (1, S) additive mask

    for l in range(n_layers):                                     # static unrolled layers
        # ---- attention: ONE fused lane-dense QKV matmul (S,H)@(H,3H) ----
        qkv = (jnp.dot(h.astype(wdt), wqkv_ref[l],
                       preferred_element_type=jnp.float32)
               + bqkv_ref[l])                                     # (S, 3H); Q pre-scaled

        # per-head scores/context: short static loop of tiny 2-D MXU dots
        # (no broadcasts of x or W, no 3-D relayout transposes)
        ctx_heads = []
        for hd in range(n_heads):
            lo = hd * head_dim
            q_h = qkv[:, lo:lo + head_dim]                        # (S, D)
            k_h = qkv[:, H + lo:H + lo + head_dim]                # (S, D)
            v_h = qkv[:, 2 * H + lo:2 * H + lo + head_dim]        # (S, D)
            sc = pl.dot(q_h, k_h, trans_b=True)                   # (S, S) = Q Kᵀ (scale folded)
            sc = sc + amask                                       # mask padded key positions
            sc = sc - jnp.max(sc, axis=-1, keepdims=True)
            p = jnp.exp(sc)
            p = p / jnp.sum(p, axis=-1, keepdims=True)            # exact softmax (matches HF)
            ctx_heads.append(jnp.dot(p, v_h, preferred_element_type=jnp.float32))
        ctx = jnp.concatenate(ctx_heads, axis=-1)                 # (S, H) == concat of heads

        # ---- output projection: ONE (S,H)@(H,H) matmul against un-split Wo ----
        attn = (jnp.dot(ctx.astype(wdt), wo_ref[l],
                        preferred_element_type=jnp.float32) + bo_ref[l])
        h1 = _layer_norm(attn + h, ln1g_ref[l], ln1b_ref[l])

        # ---- feed-forward ----
        inter = (jnp.dot(h1.astype(wdt), wi_ref[l],
                         preferred_element_type=jnp.float32) + bi_ref[l])
        # TODO(synk): HF BertModel uses exact (erf) GELU; tanh-approx differs ~1e-3.
        inter = jax.nn.gelu(inter, approximate=True)
        ffn = (jnp.dot(inter.astype(wdt), wo2_ref[l],
                       preferred_element_type=jnp.float32) + bo2_ref[l])
        h = _layer_norm(ffn + h1, ln2g_ref[l], ln2b_ref[l])

        mixed = mixed + mix_ref[l + 1] * h

    # ---- start/end gather: sum of one-hots, ONE matmul, then length masking ----
    # (a word whose start==end sub-token is counted twice, matching the torch
    #  masked_select(start) + masked_select(end) sum semantics)
    pos = jax.lax.broadcasted_iota(jnp.int32, (t_max, seq), 1)
    oh = ((pos == sidx_ref[0]).astype(jnp.float32)
          + (pos == eidx_ref[0]).astype(jnp.float32))             # (T, S)
    g = jnp.dot(oh, mixed, preferred_element_type=jnp.float32)    # (T, H)

    tok = jax.lax.broadcasted_iota(jnp.int32, (t_max, 1), 0)
    valid = tok < ntok_ref[b, 0]                                  # (T, 1) length mask
    # NOTE: output block is (1, T, H=32) -> partial-lane stores; kept because the
    # module's contract is a (B, T, H) tensor (trivial at this size).
    out_ref[0] = jnp.where(valid, g, 0.0)                         # zero padded token rows


# ------------------------------ wrappers -------------------------------------
def embed_sum(params, input_ids):
    # Glue: embedding table gathers only; the LayerNorm is fused into the kernel.
    we = params["word_emb"][input_ids]                            # (B, S, H)
    pe = params["pos_emb"][: input_ids.shape[1]][None]
    te = params["type_emb"][0][None, None]
    return (we + pe + te).astype(jnp.float32)


@functools.partial(jax.jit, static_argnums=(6,))
def bert_forward(params, input_ids, add_mask, start_idx, end_idx, n_tokens, t_max):
    """Equivalent of Bert.forward for pre-tokenized, pre-padded input."""
    x = embed_sum(params, input_ids)                              # (B, S, H) un-normalized
    B, S, H = x.shape
    L = len(params["layers"])
    NH, D, I = N_HEADS, HEAD_DIM, INTER
    scale = 1.0 / math.sqrt(D)
    wdt = MATMUL_WEIGHT_DTYPE

    def stack(name):
        return jnp.stack([lp[name] for lp in params["layers"]], axis=0)

    # fused QKV weight/bias, 1/sqrt(D) folded into the Q block -> one matmul/layer
    wqkv = jnp.concatenate([stack("wq") * scale, stack("wk"), stack("wv")],
                           axis=-1).astype(wdt)                   # (L, H, 3H)
    bqkv = jnp.concatenate([stack("bq") * scale, stack("bk"), stack("bv")],
                           axis=-1)                               # (L, 1, 3H) f32
    wo, bo = stack("wo").astype(wdt), stack("bo")                 # (L, H, H) un-split
    ln1g, ln1b = stack("ln1_g"), stack("ln1_b")
    wi, bi = stack("wi").astype(wdt), stack("bi")
    wo2, bo2 = stack("wo2").astype(wdt), stack("bo2")
    ln2g, ln2b = stack("ln2_g"), stack("ln2_b")
    embg = params["emb_ln_g"].reshape(1, H).astype(jnp.float32)
    embb = params["emb_ln_b"].reshape(1, H).astype(jnp.float32)

    # gamma * softmax(scalars) at the selected layer indices, zero elsewhere
    sm = (params["mix_gamma"] * jax.nn.softmax(params["mix_scalars"])
          ).astype(jnp.float32)
    mix_full = jnp.zeros((L + 1,), jnp.float32).at[
        jnp.asarray(LAYER_INDICES, dtype=jnp.int32)].set(sm)

    amask = add_mask.reshape(B, 1, S).astype(jnp.float32)         # additive mask
    sidx = start_idx.reshape(B, t_max, 1).astype(jnp.int32)
    eidx = end_idx.reshape(B, t_max, 1).astype(jnp.int32)
    ntok = n_tokens.reshape(B, 1).astype(jnp.int32)

    def batched(arr):                       # one block per batch element
        nrest = arr.ndim - 1
        return pl.BlockSpec((1,) + arr.shape[1:],
                            lambda b, _n=nrest: (b,) + (0,) * _n)

    def resident(arr):                      # same block every step -> fetched once
        return pl.BlockSpec(arr.shape, lambda b, _n=arr.ndim: (0,) * _n)

    in_specs = [
        pl.BlockSpec(memory_space=pltpu.SMEM),        # scalar-mix weights
        pl.BlockSpec(memory_space=pltpu.SMEM),        # n_tokens
        batched(x), batched(amask), batched(sidx), batched(eidx),
        resident(embg), resident(embb),
        resident(wqkv), resident(bqkv), resident(wo), resident(bo),
        resident(ln1g), resident(ln1b),
        resident(wi), resident(bi), resident(wo2), resident(bo2),
        resident(ln2g), resident(ln2b),
    ]
    operands = (mix_full, ntok, x, amask, sidx, eidx, embg, embb,
                wqkv, bqkv, wo, bo, ln1g, ln1b, wi, bi, wo2, bo2, ln2g, ln2b)

    # advisory cost estimate so XLA schedules embedding gathers vs kernel sensibly
    flops_layer = (2 * S * H * 3 * H            # fused QKV
                   + 2 * NH * S * S * D * 2     # scores + context
                   + 2 * S * H * H              # attention output projection
                   + 2 * S * H * I * 2)         # FFN in + out
    flops = B * (L * flops_layer + 2 * t_max * S * H)
    transc = B * L * (NH * S * S + S * I)       # softmax exp + gelu
    bytes_accessed = (sum(int(a.size) * a.dtype.itemsize for a in operands)
                      + B * t_max * H * 4)

    kernel = functools.partial(
        bert_fused_kernel, n_layers=L, n_heads=NH, head_dim=D, seq=S, t_max=t_max)

    # One fused pallas_call.  Grid over batch marked "parallel" so v7x's two
    # TensorCores split the batch (serial and nearly free on v5e/v6e).  Weight
    # blocks never change index -> VMEM-resident across all layers/steps.
    # TODO(synk): for a real 12-layer BERT, stream per-layer weights via a layer
    # grid axis (bf16, double-buffered) + a scalar-mix VMEM accumulator instead
    # of keeping all layers resident (v7x has only 64 MiB VMEM).
    return pl.pallas_call(
        kernel,
        out_shape=jax.ShapeDtypeStruct((B, t_max, H), jnp.float32),
        grid=(B,),
        in_specs=in_specs,
        out_specs=pl.BlockSpec((1, t_max, H), lambda b: (b, 0, 0)),
        compiler_params=pltpu.CompilerParams(dimension_semantics=("parallel",)),
        cost_estimate=pl.CostEstimate(flops=flops, transcendentals=transc,
                                      bytes_accessed=bytes_accessed),
    )(*operands)


# --------------------------- parameter init ----------------------------------
def init_params(key):
    def nrm(k, shape, scale=0.02):
        return scale * jax.random.normal(k, shape, dtype=jnp.float32)

    keys = iter(jax.random.split(key, 8 + N_LAYERS * 16))
    params = {
        "word_emb": nrm(next(keys), (VOCAB, HIDDEN)),
        "pos_emb": nrm(next(keys), (MAX_POS, HIDDEN)),
        "type_emb": nrm(next(keys), (2, HIDDEN)),
        "emb_ln_g": jnp.ones((HIDDEN,), jnp.float32),
        "emb_ln_b": jnp.zeros((HIDDEN,), jnp.float32),
        "mix_scalars": nrm(next(keys), (len(LAYER_INDICES),), scale=0.1),
        "mix_gamma": jnp.float32(1.0),
        "layers": [],
    }
    for _ in range(N_LAYERS):
        lp = {
            "wq": nrm(next(keys), (HIDDEN, HIDDEN)), "bq": nrm(next(keys), (1, HIDDEN)),
            "wk": nrm(next(keys), (HIDDEN, HIDDEN)), "bk": nrm(next(keys), (1, HIDDEN)),
            "wv": nrm(next(keys), (HIDDEN, HIDDEN)), "bv": nrm(next(keys), (1, HIDDEN)),
            "wo": nrm(next(keys), (HIDDEN, HIDDEN)), "bo": nrm(next(keys), (1, HIDDEN)),
            "ln1_g": jnp.ones((1, HIDDEN), jnp.float32),
            "ln1_b": jnp.zeros((1, HIDDEN), jnp.float32),
            "wi": nrm(next(keys), (HIDDEN, INTER)), "bi": nrm(next(keys), (1, INTER)),
            "wo2": nrm(next(keys), (INTER, HIDDEN)), "bo2": nrm(next(keys), (1, HIDDEN)),
            "ln2_g": jnp.ones((1, HIDDEN), jnp.float32),
            "ln2_b": jnp.zeros((1, HIDDEN), jnp.float32),
        }
        params["layers"].append(lp)
    return params


# -------------------------------- main ----------------------------------------
if __name__ == "__main__":
    key = jax.random.PRNGKey(0)
    pkey, ikey = jax.random.split(key)
    params = init_params(pkey)

    B, S = 2, 8
    lengths = jnp.array([7, 5], dtype=jnp.int32)             # sub-token lengths
    ids = jax.random.randint(ikey, (B, S), 1, VOCAB, dtype=jnp.int32)
    pos = jnp.arange(S, dtype=jnp.int32)[None, :]
    input_ids = jnp.where(pos < lengths[:, None], ids, 0)    # pad with 0
    # additive attention mask (0 valid / -10000 pad), shape (B, S), like HF's extended mask
    add_mask = jnp.where(pos < lengths[:, None], 0.0, -10000.0).astype(jnp.float32)

    # word start / end sub-token positions (one start and one end per word,
    # matching the masked_select + repack semantics of the torch module)
    n_tokens = jnp.array([[3], [2]], dtype=jnp.int32)        # (B, 1)
    t_max = 3
    start_idx = jnp.array([[1, 3, 5], [1, 3, 0]], dtype=jnp.int32)  # (B, T)
    end_idx = jnp.array([[2, 4, 6], [2, 4, 0]], dtype=jnp.int32)    # (B, T)

    out = bert_forward(params, input_ids, add_mask, start_idx, end_idx,
                       n_tokens, t_max)
    out = jax.block_until_ready(out)

    assert out.shape == (B, t_max, HIDDEN), out.shape
    assert bool(jnp.all(jnp.isfinite(out)))
    # padded token rows must be exactly zero (ret_features init of torch module)
    assert bool(jnp.all(out[1, 2] == 0.0))
    # TODO(synk): pretrained-checkpoint loading and string tokenization of the
    # original module have no Pallas equivalent; weights are synthetic.
    print("KERNEL_OK")
</pallas_src>

<mosaic_0001>
module attributes {stable_mosaic.version = 11 : i64} {
  func.func @bert_fused_kernel(%arg0: i32, %arg1: memref<3xf32, #tpu.memory_space<smem>>, %arg2: memref<2x1xi32, #tpu.memory_space<smem>>, %arg3: memref<1x8x32xf32, #tpu.memory_space<vmem>>, %arg4: memref<1x1x8xf32, #tpu.memory_space<vmem>>, %arg5: memref<1x3x1xi32, #tpu.memory_space<vmem>>, %arg6: memref<1x3x1xi32, #tpu.memory_space<vmem>>, %arg7: memref<1x32xf32, #tpu.memory_space<vmem>>, %arg8: memref<1x32xf32, #tpu.memory_space<vmem>>, %arg9: memref<2x32x96xbf16, #tpu.memory_space<vmem>>, %arg10: memref<2x1x96xf32, #tpu.memory_space<vmem>>, %arg11: memref<2x32x32xbf16, #tpu.memory_space<vmem>>, %arg12: memref<2x1x32xf32, #tpu.memory_space<vmem>>, %arg13: memref<2x1x32xf32, #tpu.memory_space<vmem>>, %arg14: memref<2x1x32xf32, #tpu.memory_space<vmem>>, %arg15: memref<2x32x64xbf16, #tpu.memory_space<vmem>>, %arg16: memref<2x1x64xf32, #tpu.memory_space<vmem>>, %arg17: memref<2x64x32xbf16, #tpu.memory_space<vmem>>, %arg18: memref<2x1x32xf32, #tpu.memory_space<vmem>>, %arg19: memref<2x1x32xf32, #tpu.memory_space<vmem>>, %arg20: memref<2x1x32xf32, #tpu.memory_space<vmem>>, %arg21: memref<1x3x32xf32, #tpu.memory_space<vmem>>) attributes {dimension_semantics = [#tpu.dimension_semantics<parallel>], iteration_bounds = array<i64: 2>, scalar_prefetch = 0 : i64, scratch_operands = 0 : i64, tpu.core_type = #tpu.core_type<tc>, window_params = [{transform_indices = @transform_0, window_bounds = array<i64: 3>}, {transform_indices = @transform_1, window_bounds = array<i64: 2, 1>}, {transform_indices = @transform_2, window_bounds = array<i64: 1, 8, 32>}, {transform_indices = @transform_3, window_bounds = array<i64: 1, 1, 8>}, {transform_indices = @transform_4, window_bounds = array<i64: 1, 3, 1>}, {transform_indices = @transform_5, window_bounds = array<i64: 1, 3, 1>}, {pipeline_mode = #tpu.pipeline_mode<synchronous>, transform_indices = @transform_6, window_bounds = array<i64: 1, 32>}, {pipeline_mode = #tpu.pipeline_mode<synchronous>, transform_indices = @transform_7, window_bounds = array<i64: 1, 32>}, {pipeline_mode = #tpu.pipeline_mode<synchronous>, transform_indices = @transform_8, window_bounds = array<i64: 2, 32, 96>}, {pipeline_mode = #tpu.pipeline_mode<synchronous>, transform_indices = @transform_9, window_bounds = array<i64: 2, 1, 96>}, {pipeline_mode = #tpu.pipeline_mode<synchronous>, transform_indices = @transform_10, window_bounds = array<i64: 2, 32, 32>}, {pipeline_mode = #tpu.pipeline_mode<synchronous>, transform_indices = @transform_11, window_bounds = array<i64: 2, 1, 32>}, {pipeline_mode = #tpu.pipeline_mode<synchronous>, transform_indices = @transform_12, window_bounds = array<i64: 2, 1, 32>}, {pipeline_mode = #tpu.pipeline_mode<synchronous>, transform_indices = @transform_13, window_bounds = array<i64: 2, 1, 32>}, {pipeline_mode = #tpu.pipeline_mode<synchronous>, transform_indices = @transform_14, window_bounds = array<i64: 2, 32, 64>}, {pipeline_mode = #tpu.pipeline_mode<synchronous>, transform_indices = @transform_15, window_bounds = array<i64: 2, 1, 64>}, {pipeline_mode = #tpu.pipeline_mode<synchronous>, transform_indices = @transform_16, window_bounds = array<i64: 2, 64, 32>}, {pipeline_mode = #tpu.pipeline_mode<synchronous>, transform_indices = @transform_17, window_bounds = array<i64: 2, 1, 32>}, {pipeline_mode = #tpu.pipeline_mode<synchronous>, transform_indices = @transform_18, window_bounds = array<i64: 2, 1, 32>}, {pipeline_mode = #tpu.pipeline_mode<synchronous>, transform_indices = @transform_19, window_bounds = array<i64: 2, 1, 32>}, {transform_indices = @transform_20, window_bounds = array<i64: 1, 3, 32>}]} {
    %c0 = arith.constant 0 : index
    %c0_0 = arith.constant 0 : index
    %c0_1 = arith.constant 0 : index
    %0 = vector.load %arg3[%c0, %c0_0, %c0_1] : memref<1x8x32xf32, #tpu.memory_space<vmem>>, vector<1x8x32xf32>
    %1 = vector.shape_cast %0 : vector<1x8x32xf32> to vector<8x32xf32>
    %c0_2 = arith.constant 0 : index
    %c0_3 = arith.constant 0 : index
    %2 = vector.load %arg7[%c0_2, %c0_3] : memref<1x32xf32, #tpu.memory_space<vmem>>, vector<1x32xf32>
    %c0_4 = arith.constant 0 : index
    %c0_5 = arith.constant 0 : index
    %3 = vector.load %arg8[%c0_4, %c0_5] : memref<1x32xf32, #tpu.memory_space<vmem>>, vector<1x32xf32>
    %cst = arith.constant dense<0.000000e+00> : vector<8xf32>
    %4 = vector.multi_reduction <add>, %1, %cst [1] : vector<8x32xf32> to vector<8xf32>
    %5 = vector.shape_cast %4 : vector<8xf32> to vector<8x1xf32>
    %cst_6 = arith.constant 3.200000e+01 : f32
    %6 = vector.broadcast %cst_6 : f32 to vector<8x1xf32>
    %7 = arith.divf %5, %6 : vector<8x1xf32>
    %8 = vector.broadcast %7 : vector<8x1xf32> to vector<8x32xf32>
    %9 = arith.subf %1, %8 : vector<8x32xf32>
    %10 = arith.mulf %9, %9 : vector<8x32xf32>
    %cst_7 = arith.constant dense<0.000000e+00> : vector<8xf32>
    %11 = vector.multi_reduction <add>, %10, %cst_7 [1] : vector<8x32xf32> to vector<8xf32>
    %12 = vector.shape_cast %11 : vector<8xf32> to vector<8x1xf32>
    %cst_8 = arith.constant 3.200000e+01 : f32
    %13 = vector.broadcast %cst_8 : f32 to vector<8x1xf32>
    %14 = arith.divf %12, %13 : vector<8x1xf32>
    %15 = vector.broadcast %7 : vector<8x1xf32> to vector<8x32xf32>
    %16 = arith.subf %1, %15 : vector<8x32xf32>
    %cst_9 = arith.constant 9.99999996E-13 : f32
    %17 = vector.broadcast %cst_9 : f32 to vector<8x1xf32>
    %18 = arith.addf %14, %17 : vector<8x1xf32>
    %19 = math.rsqrt %18 : vector<8x1xf32>
    %20 = vector.broadcast %19 : vector<8x1xf32> to vector<8x32xf32>
    %21 = arith.mulf %16, %20 : vector<8x32xf32>
    %22 = vector.broadcast %2 : vector<1x32xf32> to vector<8x32xf32>
    %23 = arith.mulf %21, %22 : vector<8x32xf32>
    %24 = vector.broadcast %3 : vector<1x32xf32> to vector<8x32xf32>
    %25 = arith.addf %23, %24 : vector<8x32xf32>
    %c0_10 = arith.constant 0 : index
    %26 = memref.load %arg1[%c0_10] : memref<3xf32, #tpu.memory_space<smem>>
    %27 = vector.broadcast %26 : f32 to vector<8x32xf32>
    %28 = arith.mulf %27, %25 : vector<8x32xf32>
    %c0_11 = arith.constant 0 : index
    %c0_12 = arith.constant 0 : index
    %c0_13 = arith.constant 0 : index
    %29 = vector.load %arg4[%c0_11, %c0_12, %c0_13] : memref<1x1x8xf32, #tpu.memory_space<vmem>>, vector<1x1x8xf32>
    %30 = vector.shape_cast %29 : vector<1x1x8xf32> to vector<1x8xf32>
    %31 = arith.truncf %25 : vector<8x32xf32> to vector<8x32xbf16>
    %c0_14 = arith.constant 0 : index
    %c0_15 = arith.constant 0 : index
    %c0_16 = arith.constant 0 : index
    %32 = vector.load %arg9[%c0_14, %c0_15, %c0_16] : memref<2x32x96xbf16, #tpu.memory_space<vmem>>, vector<1x32x96xbf16>
    %33 = vector.shape_cast %32 : vector<1x32x96xbf16> to vector<32x96xbf16>
    %cst_17 = arith.constant dense<0.000000e+00> : vector<8x96xf32>
    %34 = tpu.matmul %31, %33, %cst_17 {dimension_numbers = #tpu.dot_dimension_numbers<[1], [0], [0], [1], [0, 0, 1, 1], [], []>} : vector<8x32xbf16>, vector<32x96xbf16>, vector<8x96xf32> -> vector<8x96xf32>
    %c0_18 = arith.constant 0 : index
    %c0_19 = arith.constant 0 : index
    %c0_20 = arith.constant 0 : index
    %35 = vector.load %arg10[%c0_18, %c0_19, %c0_20] : memref<2x1x96xf32, #tpu.memory_space<vmem>>, vector<1x1x96xf32>
    %36 = vector.shape_cast %35 : vector<1x1x96xf32> to vector<1x96xf32>
    %37 = vector.broadcast %36 : vector<1x96xf32> to vector<8x96xf32>
    %38 = arith.addf %34, %37 : vector<8x96xf32>
    %39 = vector.extract_strided_slice %38 {offsets = [0, 0], sizes = [8, 8], strides = [1, 1]} : vector<8x96xf32> to vector<8x8xf32>
    %40 = vector.extract_strided_slice %38 {offsets = [0, 32], sizes = [8, 8], strides = [1, 1]} : vector<8x96xf32> to vector<8x8xf32>
    %41 = vector.extract_strided_slice %38 {offsets = [0, 64], sizes = [8, 8], strides = [1, 1]} : vector<8x96xf32> to vector<8x8xf32>
    %cst_21 = arith.constant dense<0.000000e+00> : vector<8x8xf32>
    %42 = tpu.matmul %39, %40, %cst_21 {dimension_numbers = #tpu.dot_dimension_numbers<[1], [1], [0], [0], [0, 0, 1, 0], [], []>} : vector<8x8xf32>, vector<8x8xf32>, vector<8x8xf32> -> vector<8x8xf32>
    %43 = vector.broadcast %30 : vector<1x8xf32> to vector<8x8xf32>
    %44 = arith.addf %42, %43 : vector<8x8xf32>
    %cst_22 = arith.constant dense<0xFF800000> : vector<8xf32>
    %45 = vector.multi_reduction <maximumf>, %44, %cst_22 [1] : vector<8x8xf32> to vector<8xf32>
    %46 = vector.shape_cast %45 : vector<8xf32> to vector<8x1xf32>
    %47 = vector.broadcast %46 : vector<8x1xf32> to vector<8x8xf32>
    %48 = arith.subf %44, %47 : vector<8x8xf32>
    %49 = math.exp %48 : vector<8x8xf32>
    %cst_23 = arith.constant dense<0.000000e+00> : vector<8xf32>
    %50 = vector.multi_reduction <add>, %49, %cst_23 [1] : vector<8x8xf32> to vector<8xf32>
    %51 = vector.shape_cast %50 : vector<8xf32> to vector<8x1xf32>
    %52 = vector.broadcast %51 : vector<8x1xf32> to vector<8x8xf32>
    %53 = arith.divf %49, %52 : vector<8x8xf32>
    %cst_24 = arith.constant dense<0.000000e+00> : vector<8x8xf32>
    %54 = tpu.matmul %53, %41, %cst_24 {dimension_numbers = #tpu.dot_dimension_numbers<[1], [0], [0], [1], [0, 0, 1, 1], [], []>} : vector<8x8xf32>, vector<8x8xf32>, vector<8x8xf32> -> vector<8x8xf32>
    %55 = vector.extract_strided_slice %38 {offsets = [0, 8], sizes = [8, 8], strides = [1, 1]} : vector<8x96xf32> to vector<8x8xf32>
    %56 = vector.extract_strided_slice %38 {offsets = [0, 40], sizes = [8, 8], strides = [1, 1]} : vector<8x96xf32> to vector<8x8xf32>
    %57 = vector.extract_strided_slice %38 {offsets = [0, 72], sizes = [8, 8], strides = [1, 1]} : vector<8x96xf32> to vector<8x8xf32>
    %cst_25 = arith.constant dense<0.000000e+00> : vector<8x8xf32>
    %58 = tpu.matmul %55, %56, %cst_25 {dimension_numbers = #tpu.dot_dimension_numbers<[1], [1], [0], [0], [0, 0, 1, 0], [], []>} : vector<8x8xf32>, vector<8x8xf32>, vector<8x8xf32> -> vector<8x8xf32>
    %59 = vector.broadcast %30 : vector<1x8xf32> to vector<8x8xf32>
    %60 = arith.addf %58, %59 : vector<8x8xf32>
    %cst_26 = arith.constant dense<0xFF800000> : vector<8xf32>
    %61 = vector.multi_reduction <maximumf>, %60, %cst_26 [1] : vector<8x8xf32> to vector<8xf32>
    %62 = vector.shape_cast %61 : vector<8xf32> to vector<8x1xf32>
    %63 = vector.broadcast %62 : vector<8x1xf32> to vector<8x8xf32>
    %64 = arith.subf %60, %63 : vector<8x8xf32>
    %65 = math.exp %64 : vector<8x8xf32>
    %cst_27 = arith.constant dense<0.000000e+00> : vector<8xf32>
    %66 = vector.multi_reduction <add>, %65, %cst_27 [1] : vector<8x8xf32> to vector<8xf32>
    %67 = vector.shape_cast %66 : vector<8xf32> to vector<8x1xf32>
    %68 = vector.broadcast %67 : vector<8x1xf32> to vector<8x8xf32>
    %69 = arith.divf %65, %68 : vector<8x8xf32>
    %cst_28 = arith.constant dense<0.000000e+00> : vector<8x8xf32>
    %70 = tpu.matmul %69, %57, %cst_28 {dimension_numbers = #tpu.dot_dimension_numbers<[1], [0], [0], [1], [0, 0, 1, 1], [], []>} : vector<8x8xf32>, vector<8x8xf32>, vector<8x8xf32> -> vector<8x8xf32>
    %71 = vector.extract_strided_slice %38 {offsets = [0, 16], sizes = [8, 8], strides = [1, 1]} : vector<8x96xf32> to vector<8x8xf32>
    %72 = vector.extract_strided_slice %38 {offsets = [0, 48], sizes = [8, 8], strides = [1, 1]} : vector<8x96xf32> to vector<8x8xf32>
    %73 = vector.extract_strided_slice %38 {offsets = [0, 80], sizes = [8, 8], strides = [1, 1]} : vector<8x96xf32> to vector<8x8xf32>
    %cst_29 = arith.constant dense<0.000000e+00> : vector<8x8xf32>
    %74 = tpu.matmul %71, %72, %cst_29 {dimension_numbers = #tpu.dot_dimension_numbers<[1], [1], [0], [0], [0, 0, 1, 0], [], []>} : vector<8x8xf32>, vector<8x8xf32>, vector<8x8xf32> -> vector<8x8xf32>
    %75 = vector.broadcast %30 : vector<1x8xf32> to vector<8x8xf32>
    %76 = arith.addf %74, %75 : vector<8x8xf32>
    %cst_30 = arith.constant dense<0xFF800000> : vector<8xf32>
    %77 = vector.multi_reduction <maximumf>, %76, %cst_30 [1] : vector<8x8xf32> to vector<8xf32>
    %78 = vector.shape_cast %77 : vector<8xf32> to vector<8x1xf32>
    %79 = vector.broadcast %78 : vector<8x1xf32> to vector<8x8xf32>
    %80 = arith.subf %76, %79 : vector<8x8xf32>
    %81 = math.exp %80 : vector<8x8xf32>
    %cst_31 = arith.constant dense<0.000000e+00> : vector<8xf32>
    %82 = vector.multi_reduction <add>, %81, %cst_31 [1] : vector<8x8xf32> to vector<8xf32>
    %83 = vector.shape_cast %82 : vector<8xf32> to vector<8x1xf32>
    %84 = vector.broadcast %83 : vector<8x1xf32> to vector<8x8xf32>
    %85 = arith.divf %81, %84 : vector<8x8xf32>
    %cst_32 = arith.constant dense<0.000000e+00> : vector<8x8xf32>
    %86 = tpu.matmul %85, %73, %cst_32 {dimension_numbers = #tpu.dot_dimension_numbers<[1], [0], [0], [1], [0, 0, 1, 1], [], []>} : vector<8x8xf32>, vector<8x8xf32>, vector<8x8xf32> -> vector<8x8xf32>
    %87 = vector.extract_strided_slice %38 {offsets = [0, 24], sizes = [8, 8], strides = [1, 1]} : vector<8x96xf32> to vector<8x8xf32>
    %88 = vector.extract_strided_slice %38 {offsets = [0, 56], sizes = [8, 8], strides = [1, 1]} : vector<8x96xf32> to vector<8x8xf32>
    %89 = vector.extract_strided_slice %38 {offsets = [0, 88], sizes = [8, 8], strides = [1, 1]} : vector<8x96xf32> to vector<8x8xf32>
    %cst_33 = arith.constant dense<0.000000e+00> : vector<8x8xf32>
    %90 = tpu.matmul %87, %88, %cst_33 {dimension_numbers = #tpu.dot_dimension_numbers<[1], [1], [0], [0], [0, 0, 1, 0], [], []>} : vector<8x8xf32>, vector<8x8xf32>, vector<8x8xf32> -> vector<8x8xf32>
    %91 = vector.broadcast %30 : vector<1x8xf32> to vector<8x8xf32>
    %92 = arith.addf %90, %91 : vector<8x8xf32>
    %cst_34 = arith.constant dense<0xFF800000> : vector<8xf32>
    %93 = vector.multi_reduction <maximumf>, %92, %cst_34 [1] : vector<8x8xf32> to vector<8xf32>
    %94 = vector.shape_cast %93 : vector<8xf32> to vector<8x1xf32>
    %95 = vector.broadcast %94 : vector<8x1xf32> to vector<8x8xf32>
    %96 = arith.subf %92, %95 : vector<8x8xf32>
    %97 = math.exp %96 : vector<8x8xf32>
    %cst_35 = arith.constant dense<0.000000e+00> : vector<8xf32>
    %98 = vector.multi_reduction <add>, %97, %cst_35 [1] : vector<8x8xf32> to vector<8xf32>
    %99 = vector.shape_cast %98 : vector<8xf32> to vector<8x1xf32>
    %100 = vector.broadcast %99 : vector<8x1xf32> to vector<8x8xf32>
    %101 = arith.divf %97, %100 : vector<8x8xf32>
    %cst_36 = arith.constant dense<0.000000e+00> : vector<8x8xf32>
    %102 = tpu.matmul %101, %89, %cst_36 {dimension_numbers = #tpu.dot_dimension_numbers<[1], [0], [0], [1], [0, 0, 1, 1], [], []>} : vector<8x8xf32>, vector<8x8xf32>, vector<8x8xf32> -> vector<8x8xf32>
    %103 = tpu.concatenate %54, %70, %86, %102 in 1 : vector<8x8xf32>, vector<8x8xf32>, vector<8x8xf32>, vector<8x8xf32> -> vector<8x32xf32>
    %104 = arith.truncf %103 : vector<8x32xf32> to vector<8x32xbf16>
    %c0_37 = arith.constant 0 : index
    %c0_38 = arith.constant 0 : index
    %c0_39 = arith.constant 0 : index
    %105 = vector.load %arg11[%c0_37, %c0_38, %c0_39] : memref<2x32x32xbf16, #tpu.memory_space<vmem>>, vector<1x32x32xbf16>
    %106 = vector.shape_cast %105 : vector<1x32x32xbf16> to vector<32x32xbf16>
    %cst_40 = arith.constant dense<0.000000e+00> : vector<8x32xf32>
    %107 = tpu.matmul %104, %106, %cst_40 {dimension_numbers = #tpu.dot_dimension_numbers<[1], [0], [0], [1], [0, 0, 1, 1], [], []>} : vector<8x32xbf16>, vector<32x32xbf16>, vector<8x32xf32> -> vector<8x32xf32>
    %c0_41 = arith.constant 0 : index
    %c0_42 = arith.constant 0 : index
    %c0_43 = arith.constant 0 : index
    %108 = vector.load %arg12[%c0_41, %c0_42, %c0_43] : memref<2x1x32xf32, #tpu.memory_space<vmem>>, vector<1x1x32xf32>
    %109 = vector.shape_cast %108 : vector<1x1x32xf32> to vector<1x32xf32>
    %110 = vector.broadcast %109 : vector<1x32xf32> to vector<8x32xf32>
    %111 = arith.addf %107, %110 : vector<8x32xf32>
    %112 = arith.addf %111, %25 : vector<8x32xf32>
    %c0_44 = arith.constant 0 : index
    %c0_45 = arith.constant 0 : index
    %c0_46 = arith.constant 0 : index
    %113 = vector.load %arg13[%c0_44, %c0_45, %c0_46] : memref<2x1x32xf32, #tpu.memory_space<vmem>>, vector<1x1x32xf32>
    %114 = vector.shape_cast %113 : vector<1x1x32xf32> to vector<1x32xf32>
    %c0_47 = arith.constant 0 : index
    %c0_48 = arith.constant 0 : index
    %c0_49 = arith.constant 0 : index
    %115 = vector.load %arg14[%c0_47, %c0_48, %c0_49] : memref<2x1x32xf32, #tpu.memory_space<vmem>>, vector<1x1x32xf32>
    %116 = vector.shape_cast %115 : vector<1x1x32xf32> to vector<1x32xf32>
    %cst_50 = arith.constant dense<0.000000e+00> : vector<8xf32>
    %117 = vector.multi_reduction <add>, %112, %cst_50 [1] : vector<8x32xf32> to vector<8xf32>
    %118 = vector.shape_cast %117 : vector<8xf32> to vector<8x1xf32>
    %cst_51 = arith.constant 3.200000e+01 : f32
    %119 = vector.broadcast %cst_51 : f32 to vector<8x1xf32>
    %120 = arith.divf %118, %119 : vector<8x1xf32>
    %121 = vector.broadcast %120 : vector<8x1xf32> to vector<8x32xf32>
    %122 = arith.subf %112, %121 : vector<8x32xf32>
    %123 = arith.mulf %122, %122 : vector<8x32xf32>
    %cst_52 = arith.constant dense<0.000000e+00> : vector<8xf32>
    %124 = vector.multi_reduction <add>, %123, %cst_52 [1] : vector<8x32xf32> to vector<8xf32>
    %125 = vector.shape_cast %124 : vector<8xf32> to vector<8x1xf32>
    %cst_53 = arith.constant 3.200000e+01 : f32
    %126 = vector.broadcast %cst_53 : f32 to vector<8x1xf32>
    %127 = arith.divf %125, %126 : vector<8x1xf32>
    %128 = vector.broadcast %120 : vector<8x1xf32> to vector<8x32xf32>
    %129 = arith.subf %112, %128 : vector<8x32xf32>
    %cst_54 = arith.constant 9.99999996E-13 : f32
    %130 = vector.broadcast %cst_54 : f32 to vector<8x1xf32>
    %131 = arith.addf %127, %130 : vector<8x1xf32>
    %132 = math.rsqrt %131 : vector<8x1xf32>
    %133 = vector.broadcast %132 : vector<8x1xf32> to vector<8x32xf32>
    %134 = arith.mulf %129, %133 : vector<8x32xf32>
    %135 = vector.broadcast %114 : vector<1x32xf32> to vector<8x32xf32>
    %136 = arith.mulf %134, %135 : vector<8x32xf32>
    %137 = vector.broadcast %116 : vector<1x32xf32> to vector<8x32xf32>
    %138 = arith.addf %136, %137 : vector<8x32xf32>
    %139 = arith.truncf %138 : vector<8x32xf32> to vector<8x32xbf16>
    %c0_55 = arith.constant 0 : index
    %c0_56 = arith.constant 0 : index
    %c0_57 = arith.constant 0 : index
    %140 = vector.load %arg15[%c0_55, %c0_56, %c0_57] : memref<2x32x64xbf16, #tpu.memory_space<vmem>>, vector<1x32x64xbf16>
    %141 = vector.shape_cast %140 : vector<1x32x64xbf16> to vector<32x64xbf16>
    %cst_58 = arith.constant dense<0.000000e+00> : vector<8x64xf32>
    %142 = tpu.matmul %139, %141, %cst_58 {dimension_numbers = #tpu.dot_dimension_numbers<[1], [0], [0], [1], [0, 0, 1, 1], [], []>} : vector<8x32xbf16>, vector<32x64xbf16>, vector<8x64xf32> -> vector<8x64xf32>
    %c0_59 = arith.constant 0 : index
    %c0_60 = arith.constant 0 : index
    %c0_61 = arith.constant 0 : index
    %143 = vector.load %arg16[%c0_59, %c0_60, %c0_61] : memref<2x1x64xf32, #tpu.memory_space<vmem>>, vector<1x1x64xf32>
    %144 = vector.shape_cast %143 : vector<1x1x64xf32> to vector<1x64xf32>
    %145 = vector.broadcast %144 : vector<1x64xf32> to vector<8x64xf32>
    %146 = arith.addf %142, %145 : vector<8x64xf32>
    %147 = arith.mulf %146, %146 : vector<8x64xf32>
    %148 = arith.mulf %146, %147 : vector<8x64xf32>
    %cst_62 = arith.constant 4.471500e-02 : f32
    %149 = vector.broadcast %cst_62 : f32 to vector<8x64xf32>
    %150 = arith.mulf %149, %148 : vector<8x64xf32>
    %151 = arith.addf %146, %150 : vector<8x64xf32>
    %cst_63 = arith.constant 0.797884583 : f32
    %152 = vector.broadcast %cst_63 : f32 to vector<8x64xf32>
    %153 = arith.mulf %152, %151 : vector<8x64xf32>
    %154 = math.tanh %153 : vector<8x64xf32>
    %cst_64 = arith.constant 1.000000e+00 : f32
    %155 = vector.broadcast %cst_64 : f32 to vector<8x64xf32>
    %156 = arith.addf %155, %154 : vector<8x64xf32>
    %cst_65 = arith.constant 5.000000e-01 : f32
    %157 = vector.broadcast %cst_65 : f32 to vector<8x64xf32>
    %158 = arith.mulf %157, %156 : vector<8x64xf32>
    %159 = arith.mulf %146, %158 : vector<8x64xf32>
    %160 = arith.truncf %159 : vector<8x64xf32> to vector<8x64xbf16>
    %c0_66 = arith.constant 0 : index
    %c0_67 = arith.constant 0 : index
    %c0_68 = arith.constant 0 : index
    %161 = vector.load %arg17[%c0_66, %c0_67, %c0_68] : memref<2x64x32xbf16, #tpu.memory_space<vmem>>, vector<1x64x32xbf16>
    %162 = vector.shape_cast %161 : vector<1x64x32xbf16> to vector<64x32xbf16>
    %cst_69 = arith.constant dense<0.000000e+00> : vector<8x32xf32>
    %163 = tpu.matmul %160, %162, %cst_69 {dimension_numbers = #tpu.dot_dimension_numbers<[1], [0], [0], [1], [0, 0, 1, 1], [], []>} : vector<8x64xbf16>, vector<64x32xbf16>, vector<8x32xf32> -> vector<8x32xf32>
    %c0_70 = arith.constant 0 : index
    %c0_71 = arith.constant 0 : index
    %c0_72 = arith.constant 0 : index
    %164 = vector.load %arg18[%c0_70, %c0_71, %c0_72] : memref<2x1x32xf32, #tpu.memory_space<vmem>>, vector<1x1x32xf32>
    %165 = vector.shape_cast %164 : vector<1x1x32xf32> to vector<1x32xf32>
    %166 = vector.broadcast %165 : vector<1x32xf32> to vector<8x32xf32>
    %167 = arith.addf %163, %166 : vector<8x32xf32>
    %168 = arith.addf %167, %138 : vector<8x32xf32>
    %c0_73 = arith.constant 0 : index
    %c0_74 = arith.constant 0 : index
    %c0_75 = arith.constant 0 : index
    %169 = vector.load %arg19[%c0_73, %c0_74, %c0_75] : memref<2x1x32xf32, #tpu.memory_space<vmem>>, vector<1x1x32xf32>
    %170 = vector.shape_cast %169 : vector<1x1x32xf32> to vector<1x32xf32>
    %c0_76 = arith.constant 0 : index
    %c0_77 = arith.constant 0 : index
    %c0_78 = arith.constant 0 : index
    %171 = vector.load %arg20[%c0_76, %c0_77, %c0_78] : memref<2x1x32xf32, #tpu.memory_space<vmem>>, vector<1x1x32xf32>
    %172 = vector.shape_cast %171 : vector<1x1x32xf32> to vector<1x32xf32>
    %cst_79 = arith.constant dense<0.000000e+00> : vector<8xf32>
    %173 = vector.multi_reduction <add>, %168, %cst_79 [1] : vector<8x32xf32> to vector<8xf32>
    %174 = vector.shape_cast %173 : vector<8xf32> to vector<8x1xf32>
    %cst_80 = arith.constant 3.200000e+01 : f32
    %175 = vector.broadcast %cst_80 : f32 to vector<8x1xf32>
    %176 = arith.divf %174, %175 : vector<8x1xf32>
    %177 = vector.broadcast %176 : vector<8x1xf32> to vector<8x32xf32>
    %178 = arith.subf %168, %177 : vector<8x32xf32>
    %179 = arith.mulf %178, %178 : vector<8x32xf32>
    %cst_81 = arith.constant dense<0.000000e+00> : vector<8xf32>
    %180 = vector.multi_reduction <add>, %179, %cst_81 [1] : vector<8x32xf32> to vector<8xf32>
    %181 = vector.shape_cast %180 : vector<8xf32> to vector<8x1xf32>
    %cst_82 = arith.constant 3.200000e+01 : f32
    %182 = vector.broadcast %cst_82 : f32 to vector<8x1xf32>
    %183 = arith.divf %181, %182 : vector<8x1xf32>
    %184 = vector.broadcast %176 : vector<8x1xf32> to vector<8x32xf32>
    %185 = arith.subf %168, %184 : vector<8x32xf32>
    %cst_83 = arith.constant 9.99999996E-13 : f32
    %186 = vector.broadcast %cst_83 : f32 to vector<8x1xf32>
    %187 = arith.addf %183, %186 : vector<8x1xf32>
    %188 = math.rsqrt %187 : vector<8x1xf32>
    %189 = vector.broadcast %188 : vector<8x1xf32> to vector<8x32xf32>
    %190 = arith.mulf %185, %189 : vector<8x32xf32>
    %191 = vector.broadcast %170 : vector<1x32xf32> to vector<8x32xf32>
    %192 = arith.mulf %190, %191 : vector<8x32xf32>
    %193 = vector.broadcast %172 : vector<1x32xf32> to vector<8x32xf32>
    %194 = arith.addf %192, %193 : vector<8x32xf32>
    %c1 = arith.constant 1 : index
    %195 = memref.load %arg1[%c1] : memref<3xf32, #tpu.memory_space<smem>>
    %196 = vector.broadcast %195 : f32 to vector<8x32xf32>
    %197 = arith.mulf %196, %194 : vector<8x32xf32>
    %198 = arith.addf %28, %197 : vector<8x32xf32>
    %199 = arith.truncf %194 : vector<8x32xf32> to vector<8x32xbf16>
    %c1_84 = arith.constant 1 : index
    %c0_85 = arith.constant 0 : index
    %c0_86 = arith.constant 0 : index
    %200 = vector.load %arg9[%c1_84, %c0_85, %c0_86] : memref<2x32x96xbf16, #tpu.memory_space<vmem>>, vector<1x32x96xbf16>
    %201 = vector.shape_cast %200 : vector<1x32x96xbf16> to vector<32x96xbf16>
    %cst_87 = arith.constant dense<0.000000e+00> : vector<8x96xf32>
    %202 = tpu.matmul %199, %201, %cst_87 {dimension_numbers = #tpu.dot_dimension_numbers<[1], [0], [0], [1], [0, 0, 1, 1], [], []>} : vector<8x32xbf16>, vector<32x96xbf16>, vector<8x96xf32> -> vector<8x96xf32>
    %c1_88 = arith.constant 1 : index
    %c0_89 = arith.constant 0 : index
    %c0_90 = arith.constant 0 : index
    %203 = vector.load %arg10[%c1_88, %c0_89, %c0_90] : memref<2x1x96xf32, #tpu.memory_space<vmem>>, vector<1x1x96xf32>
    %204 = vector.shape_cast %203 : vector<1x1x96xf32> to vector<1x96xf32>
    %205 = vector.broadcast %204 : vector<1x96xf32> to vector<8x96xf32>
    %206 = arith.addf %202, %205 : vector<8x96xf32>
    %207 = vector.extract_strided_slice %206 {offsets = [0, 0], sizes = [8, 8], strides = [1, 1]} : vector<8x96xf32> to vector<8x8xf32>
    %208 = vector.extract_strided_slice %206 {offsets = [0, 32], sizes = [8, 8], strides = [1, 1]} : vector<8x96xf32> to vector<8x8xf32>
    %209 = vector.extract_strided_slice %206 {offsets = [0, 64], sizes = [8, 8], strides = [1, 1]} : vector<8x96xf32> to vector<8x8xf32>
    %cst_91 = arith.constant dense<0.000000e+00> : vector<8x8xf32>
    %210 = tpu.matmul %207, %208, %cst_91 {dimension_numbers = #tpu.dot_dimension_numbers<[1], [1], [0], [0], [0, 0, 1, 0], [], []>} : vector<8x8xf32>, vector<8x8xf32>, vector<8x8xf32> -> vector<8x8xf32>
    %211 = vector.broadcast %30 : vector<1x8xf32> to vector<8x8xf32>
    %212 = arith.addf %210, %211 : vector<8x8xf32>
    %cst_92 = arith.constant dense<0xFF800000> : vector<8xf32>
    %213 = vector.multi_reduction <maximumf>, %212, %cst_92 [1] : vector<8x8xf32> to vector<8xf32>
    %214 = vector.shape_cast %213 : vector<8xf32> to vector<8x1xf32>
    %215 = vector.broadcast %214 : vector<8x1xf32> to vector<8x8xf32>
    %216 = arith.subf %212, %215 : vector<8x8xf32>
    %217 = math.exp %216 : vector<8x8xf32>
    %cst_93 = arith.constant dense<0.000000e+00> : vector<8xf32>
    %218 = vector.multi_reduction <add>, %217, %cst_93 [1] : vector<8x8xf32> to vector<8xf32>
    %219 = vector.shape_cast %218 : vector<8xf32> to vector<8x1xf32>
    %220 = vector.broadcast %219 : vector<8x1xf32> to vector<8x8xf32>
    %221 = arith.divf %217, %220 : vector<8x8xf32>
    %cst_94 = arith.constant dense<0.000000e+00> : vector<8x8xf32>
    %222 = tpu.matmul %221, %209, %cst_94 {dimension_numbers = #tpu.dot_dimension_numbers<[1], [0], [0], [1], [0, 0, 1, 1], [], []>} : vector<8x8xf32>, vector<8x8xf32>, vector<8x8xf32> -> vector<8x8xf32>
    %223 = vector.extract_strided_slice %206 {offsets = [0, 8], sizes = [8, 8], strides = [1, 1]} : vector<8x96xf32> to vector<8x8xf32>
    %224 = vector.extract_strided_slice %206 {offsets = [0, 40], sizes = [8, 8], strides = [1, 1]} : vector<8x96xf32> to vector<8x8xf32>
    %225 = vector.extract_strided_slice %206 {offsets = [0, 72], sizes = [8, 8], strides = [1, 1]} : vector<8x96xf32> to vector<8x8xf32>
    %cst_95 = arith.constant dense<0.000000e+00> : vector<8x8xf32>
    %226 = tpu.matmul %223, %224, %cst_95 {dimension_numbers = #tpu.dot_dimension_numbers<[1], [1], [0], [0], [0, 0, 1, 0], [], []>} : vector<8x8xf32>, vector<8x8xf32>, vector<8x8xf32> -> vector<8x8xf32>
    %227 = vector.broadcast %30 : vector<1x8xf32> to vector<8x8xf32>
    %228 = arith.addf %226, %227 : vector<8x8xf32>
    %cst_96 = arith.constant dense<0xFF800000> : vector<8xf32>
    %229 = vector.multi_reduction <maximumf>, %228, %cst_96 [1] : vector<8x8xf32> to vector<8xf32>
    %230 = vector.shape_cast %229 : vector<8xf32> to vector<8x1xf32>
    %231 = vector.broadcast %230 : vector<8x1xf32> to vector<8x8xf32>
    %232 = arith.subf %228, %231 : vector<8x8xf32>
    %233 = math.exp %232 : vector<8x8xf32>
    %cst_97 = arith.constant dense<0.000000e+00> : vector<8xf32>
    %234 = vector.multi_reduction <add>, %233, %cst_97 [1] : vector<8x8xf32> to vector<8xf32>
    %235 = vector.shape_cast %234 : vector<8xf32> to vector<8x1xf32>
    %236 = vector.broadcast %235 : vector<8x1xf32> to vector<8x8xf32>
    %237 = arith.divf %233, %236 : vector<8x8xf32>
    %cst_98 = arith.constant dense<0.000000e+00> : vector<8x8xf32>
    %238 = tpu.matmul %237, %225, %cst_98 {dimension_numbers = #tpu.dot_dimension_numbers<[1], [0], [0], [1], [0, 0, 1, 1], [], []>} : vector<8x8xf32>, vector<8x8xf32>, vector<8x8xf32> -> vector<8x8xf32>
    %239 = vector.extract_strided_slice %206 {offsets = [0, 16], sizes = [8, 8], strides = [1, 1]} : vector<8x96xf32> to vector<8x8xf32>
    %240 = vector.extract_strided_slice %206 {offsets = [0, 48], sizes = [8, 8], strides = [1, 1]} : vector<8x96xf32> to vector<8x8xf32>
    %241 = vector.extract_strided_slice %206 {offsets = [0, 80], sizes = [8, 8], strides = [1, 1]} : vector<8x96xf32> to vector<8x8xf32>
    %cst_99 = arith.constant dense<0.000000e+00> : vector<8x8xf32>
    %242 = tpu.matmul %239, %240, %cst_99 {dimension_numbers = #tpu.dot_dimension_numbers<[1], [1], [0], [0], [0, 0, 1, 0], [], []>} : vector<8x8xf32>, vector<8x8xf32>, vector<8x8xf32> -> vector<8x8xf32>
    %243 = vector.broadcast %30 : vector<1x8xf32> to vector<8x8xf32>
    %244 = arith.addf %242, %243 : vector<8x8xf32>
    %cst_100 = arith.constant dense<0xFF800000> : vector<8xf32>
    %245 = vector.multi_reduction <maximumf>, %244, %cst_100 [1] : vector<8x8xf32> to vector<8xf32>
    %246 = vector.shape_cast %245 : vector<8xf32> to vector<8x1xf32>
    %247 = vector.broadcast %246 : vector<8x1xf32> to vector<8x8xf32>
    %248 = arith.subf %244, %247 : vector<8x8xf32>
    %249 = math.exp %248 : vector<8x8xf32>
    %cst_101 = arith.constant dense<0.000000e+00> : vector<8xf32>
    %250 = vector.multi_reduction <add>, %249, %cst_101 [1] : vector<8x8xf32> to vector<8xf32>
    %251 = vector.shape_cast %250 : vector<8xf32> to vector<8x1xf32>
    %252 = vector.broadcast %251 : vector<8x1xf32> to vector<8x8xf32>
    %253 = arith.divf %249, %252 : vector<8x8xf32>
    %cst_102 = arith.constant dense<0.000000e+00> : vector<8x8xf32>
    %254 = tpu.matmul %253, %241, %cst_102 {dimension_numbers = #tpu.dot_dimension_numbers<[1], [0], [0], [1], [0, 0, 1, 1], [], []>} : vector<8x8xf32>, vector<8x8xf32>, vector<8x8xf32> -> vector<8x8xf32>
    %255 = vector.extract_strided_slice %206 {offsets = [0, 24], sizes = [8, 8], strides = [1, 1]} : vector<8x96xf32> to vector<8x8xf32>
    %256 = vector.extract_strided_slice %206 {offsets = [0, 56], sizes = [8, 8], strides = [1, 1]} : vector<8x96xf32> to vector<8x8xf32>
    %257 = vector.extract_strided_slice %206 {offsets = [0, 88], sizes = [8, 8], strides = [1, 1]} : vector<8x96xf32> to vector<8x8xf32>
    %cst_103 = arith.constant dense<0.000000e+00> : vector<8x8xf32>
    %258 = tpu.matmul %255, %256, %cst_103 {dimension_numbers = #tpu.dot_dimension_numbers<[1], [1], [0], [0], [0, 0, 1, 0], [], []>} : vector<8x8xf32>, vector<8x8xf32>, vector<8x8xf32> -> vector<8x8xf32>
    %259 = vector.broadcast %30 : vector<1x8xf32> to vector<8x8xf32>
    %260 = arith.addf %258, %259 : vector<8x8xf32>
    %cst_104 = arith.constant dense<0xFF800000> : vector<8xf32>
    %261 = vector.multi_reduction <maximumf>, %260, %cst_104 [1] : vector<8x8xf32> to vector<8xf32>
    %262 = vector.shape_cast %261 : vector<8xf32> to vector<8x1xf32>
    %263 = vector.broadcast %262 : vector<8x1xf32> to vector<8x8xf32>
    %264 = arith.subf %260, %263 : vector<8x8xf32>
    %265 = math.exp %264 : vector<8x8xf32>
    %cst_105 = arith.constant dense<0.000000e+00> : vector<8xf32>
    %266 = vector.multi_reduction <add>, %265, %cst_105 [1] : vector<8x8xf32> to vector<8xf32>
    %267 = vector.shape_cast %266 : vector<8xf32> to vector<8x1xf32>
    %268 = vector.broadcast %267 : vector<8x1xf32> to vector<8x8xf32>
    %269 = arith.divf %265, %268 : vector<8x8xf32>
    %cst_106 = arith.constant dense<0.000000e+00> : vector<8x8xf32>
    %270 = tpu.matmul %269, %257, %cst_106 {dimension_numbers = #tpu.dot_dimension_numbers<[1], [0], [0], [1], [0, 0, 1, 1], [], []>} : vector<8x8xf32>, vector<8x8xf32>, vector<8x8xf32> -> vector<8x8xf32>
    %271 = tpu.concatenate %222, %238, %254, %270 in 1 : vector<8x8xf32>, vector<8x8xf32>, vector<8x8xf32>, vector<8x8xf32> -> vector<8x32xf32>
    %272 = arith.truncf %271 : vector<8x32xf32> to vector<8x32xbf16>
    %c1_107 = arith.constant 1 : index
    %c0_108 = arith.constant 0 : index
    %c0_109 = arith.constant 0 : index
    %273 = vector.load %arg11[%c1_107, %c0_108, %c0_109] : memref<2x32x32xbf16, #tpu.memory_space<vmem>>, vector<1x32x32xbf16>
    %274 = vector.shape_cast %273 : vector<1x32x32xbf16> to vector<32x32xbf16>
    %cst_110 = arith.constant dense<0.000000e+00> : vector<8x32xf32>
    %275 = tpu.matmul %272, %274, %cst_110 {dimension_numbers = #tpu.dot_dimension_numbers<[1], [0], [0], [1], [0, 0, 1, 1], [], []>} : vector<8x32xbf16>, vector<32x32xbf16>, vector<8x32xf32> -> vector<8x32xf32>
    %c1_111 = arith.constant 1 : index
    %c0_112 = arith.constant 0 : index
    %c0_113 = arith.constant 0 : index
    %276 = vector.load %arg12[%c1_111, %c0_112, %c0_113] : memref<2x1x32xf32, #tpu.memory_space<vmem>>, vector<1x1x32xf32>
    %277 = vector.shape_cast %276 : vector<1x1x32xf32> to vector<1x32xf32>
    %278 = vector.broadcast %277 : vector<1x32xf32> to vector<8x32xf32>
    %279 = arith.addf %275, %278 : vector<8x32xf32>
    %280 = arith.addf %279, %194 : vector<8x32xf32>
    %c1_114 = arith.constant 1 : index
    %c0_115 = arith.constant 0 : index
    %c0_116 = arith.constant 0 : index
    %281 = vector.load %arg13[%c1_114, %c0_115, %c0_116] : memref<2x1x32xf32, #tpu.memory_space<vmem>>, vector<1x1x32xf32>
    %282 = vector.shape_cast %281 : vector<1x1x32xf32> to vector<1x32xf32>
    %c1_117 = arith.constant 1 : index
    %c0_118 = arith.constant 0 : index
    %c0_119 = arith.constant 0 : index
    %283 = vector.load %arg14[%c1_117, %c0_118, %c0_119] : memref<2x1x32xf32, #tpu.memory_space<vmem>>, vector<1x1x32xf32>
    %284 = vector.shape_cast %283 : vector<1x1x32xf32> to vector<1x32xf32>
    %cst_120 = arith.constant dense<0.000000e+00> : vector<8xf32>
    %285 = vector.multi_reduction <add>, %280, %cst_120 [1] : vector<8x32xf32> to vector<8xf32>
    %286 = vector.shape_cast %285 : vector<8xf32> to vector<8x1xf32>
    %cst_121 = arith.constant 3.200000e+01 : f32
    %287 = vector.broadcast %cst_121 : f32 to vector<8x1xf32>
    %288 = arith.divf %286, %287 : vector<8x1xf32>
    %289 = vector.broadcast %288 : vector<8x1xf32> to vector<8x32xf32>
    %290 = arith.subf %280, %289 : vector<8x32xf32>
    %291 = arith.mulf %290, %290 : vector<8x32xf32>
    %cst_122 = arith.constant dense<0.000000e+00> : vector<8xf32>
    %292 = vector.multi_reduction <add>, %291, %cst_122 [1] : vector<8x32xf32> to vector<8xf32>
    %293 = vector.shape_cast %292 : vector<8xf32> to vector<8x1xf32>
    %cst_123 = arith.constant 3.200000e+01 : f32
    %294 = vector.broadcast %cst_123 : f32 to vector<8x1xf32>
    %295 = arith.divf %293, %294 : vector<8x1xf32>
    %296 = vector.broadcast %288 : vector<8x1xf32> to vector<8x32xf32>
    %297 = arith.subf %280, %296 : vector<8x32xf32>
    %cst_124 = arith.constant 9.99999996E-13 : f32
    %298 = vector.broadcast %cst_124 : f32 to vector<8x1xf32>
    %299 = arith.addf %295, %298 : vector<8x1xf32>
    %300 = math.rsqrt %299 : vector<8x1xf32>
    %301 = vector.broadcast %300 : vector<8x1xf32> to vector<8x32xf32>
    %302 = arith.mulf %297, %301 : vector<8x32xf32>
    %303 = vector.broadcast %282 : vector<1x32xf32> to vector<8x32xf32>
    %304 = arith.mulf %302, %303 : vector<8x32xf32>
    %305 = vector.broadcast %284 : vector<1x32xf32> to vector<8x32xf32>
    %306 = arith.addf %304, %305 : vector<8x32xf32>
    %307 = arith.truncf %306 : vector<8x32xf32> to vector<8x32xbf16>
    %c1_125 = arith.constant 1 : index
    %c0_126 = arith.constant 0 : index
    %c0_127 = arith.constant 0 : index
    %308 = vector.load %arg15[%c1_125, %c0_126, %c0_127] : memref<2x32x64xbf16, #tpu.memory_space<vmem>>, vector<1x32x64xbf16>
    %309 = vector.shape_cast %308 : vector<1x32x64xbf16> to vector<32x64xbf16>
    %cst_128 = arith.constant dense<0.000000e+00> : vector<8x64xf32>
    %310 = tpu.matmul %307, %309, %cst_128 {dimension_numbers = #tpu.dot_dimension_numbers<[1], [0], [0], [1], [0, 0, 1, 1], [], []>} : vector<8x32xbf16>, vector<32x64xbf16>, vector<8x64xf32> -> vector<8x64xf32>
    %c1_129 = arith.constant 1 : index
    %c0_130 = arith.constant 0 : index
    %c0_131 = arith.constant 0 : index
    %311 = vector.load %arg16[%c1_129, %c0_130, %c0_131] : memref<2x1x64xf32, #tpu.memory_space<vmem>>, vector<1x1x64xf32>
    %312 = vector.shape_cast %311 : vector<1x1x64xf32> to vector<1x64xf32>
    %313 = vector.broadcast %312 : vector<1x64xf32> to vector<8x64xf32>
    %314 = arith.addf %310, %313 : vector<8x64xf32>
    %315 = arith.mulf %314, %314 : vector<8x64xf32>
    %316 = arith.mulf %314, %315 : vector<8x64xf32>
    %cst_132 = arith.constant 4.471500e-02 : f32
    %317 = vector.broadcast %cst_132 : f32 to vector<8x64xf32>
    %318 = arith.mulf %317, %316 : vector<8x64xf32>
    %319 = arith.addf %314, %318 : vector<8x64xf32>
    %cst_133 = arith.constant 0.797884583 : f32
    %320 = vector.broadcast %cst_133 : f32 to vector<8x64xf32>
    %321 = arith.mulf %320, %319 : vector<8x64xf32>
    %322 = math.tanh %321 : vector<8x64xf32>
    %cst_134 = arith.constant 1.000000e+00 : f32
    %323 = vector.broadcast %cst_134 : f32 to vector<8x64xf32>
    %324 = arith.addf %323, %322 : vector<8x64xf32>
    %cst_135 = arith.constant 5.000000e-01 : f32
    %325 = vector.broadcast %cst_135 : f32 to vector<8x64xf32>
    %326 = arith.mulf %325, %324 : vector<8x64xf32>
    %327 = arith.mulf %314, %326 : vector<8x64xf32>
    %328 = arith.truncf %327 : vector<8x64xf32> to vector<8x64xbf16>
    %c1_136 = arith.constant 1 : index
    %c0_137 = arith.constant 0 : index
    %c0_138 = arith.constant 0 : index
    %329 = vector.load %arg17[%c1_136, %c0_137, %c0_138] : memref<2x64x32xbf16, #tpu.memory_space<vmem>>, vector<1x64x32xbf16>
    %330 = vector.shape_cast %329 : vector<1x64x32xbf16> to vector<64x32xbf16>
    %cst_139 = arith.constant dense<0.000000e+00> : vector<8x32xf32>
    %331 = tpu.matmul %328, %330, %cst_139 {dimension_numbers = #tpu.dot_dimension_numbers<[1], [0], [0], [1], [0, 0, 1, 1], [], []>} : vector<8x64xbf16>, vector<64x32xbf16>, vector<8x32xf32> -> vector<8x32xf32>
    %c1_140 = arith.constant 1 : index
    %c0_141 = arith.constant 0 : index
    %c0_142 = arith.constant 0 : index
    %332 = vector.load %arg18[%c1_140, %c0_141, %c0_142] : memref<2x1x32xf32, #tpu.memory_space<vmem>>, vector<1x1x32xf32>
    %333 = vector.shape_cast %332 : vector<1x1x32xf32> to vector<1x32xf32>
    %334 = vector.broadcast %333 : vector<1x32xf32> to vector<8x32xf32>
    %335 = arith.addf %331, %334 : vector<8x32xf32>
    %336 = arith.addf %335, %306 : vector<8x32xf32>
    %c1_143 = arith.constant 1 : index
    %c0_144 = arith.constant 0 : index
    %c0_145 = arith.constant 0 : index
    %337 = vector.load %arg19[%c1_143, %c0_144, %c0_145] : memref<2x1x32xf32, #tpu.memory_space<vmem>>, vector<1x1x32xf32>
    %338 = vector.shape_cast %337 : vector<1x1x32xf32> to vector<1x32xf32>
    %c1_146 = arith.constant 1 : index
    %c0_147 = arith.constant 0 : index
    %c0_148 = arith.constant 0 : index
    %339 = vector.load %arg20[%c1_146, %c0_147, %c0_148] : memref<2x1x32xf32, #tpu.memory_space<vmem>>, vector<1x1x32xf32>
    %340 = vector.shape_cast %339 : vector<1x1x32xf32> to vector<1x32xf32>
    %cst_149 = arith.constant dense<0.000000e+00> : vector<8xf32>
    %341 = vector.multi_reduction <add>, %336, %cst_149 [1] : vector<8x32xf32> to vector<8xf32>
    %342 = vector.shape_cast %341 : vector<8xf32> to vector<8x1xf32>
    %cst_150 = arith.constant 3.200000e+01 : f32
    %343 = vector.broadcast %cst_150 : f32 to vector<8x1xf32>
    %344 = arith.divf %342, %343 : vector<8x1xf32>
    %345 = vector.broadcast %344 : vector<8x1xf32> to vector<8x32xf32>
    %346 = arith.subf %336, %345 : vector<8x32xf32>
    %347 = arith.mulf %346, %346 : vector<8x32xf32>
    %cst_151 = arith.constant dense<0.000000e+00> : vector<8xf32>
    %348 = vector.multi_reduction <add>, %347, %cst_151 [1] : vector<8x32xf32> to vector<8xf32>
    %349 = vector.shape_cast %348 : vector<8xf32> to vector<8x1xf32>
    %cst_152 = arith.constant 3.200000e+01 : f32
    %350 = vector.broadcast %cst_152 : f32 to vector<8x1xf32>
    %351 = arith.divf %349, %350 : vector<8x1xf32>
    %352 = vector.broadcast %344 : vector<8x1xf32> to vector<8x32xf32>
    %353 = arith.subf %336, %352 : vector<8x32xf32>
    %cst_153 = arith.constant 9.99999996E-13 : f32
    %354 = vector.broadcast %cst_153 : f32 to vector<8x1xf32>
    %355 = arith.addf %351, %354 : vector<8x1xf32>
    %356 = math.rsqrt %355 : vector<8x1xf32>
    %357 = vector.broadcast %356 : vector<8x1xf32> to vector<8x32xf32>
    %358 = arith.mulf %353, %357 : vector<8x32xf32>
    %359 = vector.broadcast %338 : vector<1x32xf32> to vector<8x32xf32>
    %360 = arith.mulf %358, %359 : vector<8x32xf32>
    %361 = vector.broadcast %340 : vector<1x32xf32> to vector<8x32xf32>
    %362 = arith.addf %360, %361 : vector<8x32xf32>
    %c2 = arith.constant 2 : index
    %363 = memref.load %arg1[%c2] : memref<3xf32, #tpu.memory_space<smem>>
    %364 = vector.broadcast %363 : f32 to vector<8x32xf32>
    %365 = arith.mulf %364, %362 : vector<8x32xf32>
    %366 = arith.addf %198, %365 : vector<8x32xf32>
    %367 = tpu.iota {dimensions = array<i32: 1>} : vector<3x8xi32>
    %c0_154 = arith.constant 0 : index
    %c0_155 = arith.constant 0 : index
    %c0_156 = arith.constant 0 : index
    %368 = vector.load %arg5[%c0_154, %c0_155, %c0_156] : memref<1x3x1xi32, #tpu.memory_space<vmem>>, vector<1x3x1xi32>
    %369 = vector.shape_cast %368 : vector<1x3x1xi32> to vector<3x1xi32>
    %370 = vector.broadcast %369 : vector<3x1xi32> to vector<3x8xi32>
    %371 = arith.cmpi eq, %367, %370 : vector<3x8xi32>
    %372 = arith.extui %371 : vector<3x8xi1> to vector<3x8xi32>
    %373 = arith.sitofp %372 : vector<3x8xi32> to vector<3x8xf32>
    %c0_157 = arith.constant 0 : index
    %c0_158 = arith.constant 0 : index
    %c0_159 = arith.constant 0 : index
    %374 = vector.load %arg6[%c0_157, %c0_158, %c0_159] : memref<1x3x1xi32, #tpu.memory_space<vmem>>, vector<1x3x1xi32>
    %375 = vector.shape_cast %374 : vector<1x3x1xi32> to vector<3x1xi32>
    %376 = vector.broadcast %375 : vector<3x1xi32> to vector<3x8xi32>
    %377 = arith.cmpi eq, %367, %376 : vector<3x8xi32>
    %378 = arith.extui %377 : vector<3x8xi1> to vector<3x8xi32>
    %379 = arith.sitofp %378 : vector<3x8xi32> to vector<3x8xf32>
    %380 = arith.addf %373, %379 : vector<3x8xf32>
    %cst_160 = arith.constant dense<0.000000e+00> : vector<3x32xf32>
    %381 = tpu.matmul %380, %366, %cst_160 {dimension_numbers = #tpu.dot_dimension_numbers<[1], [0], [0], [1], [0, 0, 1, 1], [], []>} : vector<3x8xf32>, vector<8x32xf32>, vector<3x32xf32> -> vector<3x32xf32>
    %382 = tpu.iota {dimensions = array<i32: 0>} : vector<3x1xi32>
    %383 = arith.index_cast %arg0 : i32 to index
    %c0_161 = arith.constant 0 : index
    %384 = memref.load %arg2[%383, %c0_161] : memref<2x1xi32, #tpu.memory_space<smem>>
    %385 = vector.broadcast %384 : i32 to vector<3x1xi32>
    %386 = arith.cmpi slt, %382, %385 : vector<3x1xi32>
    %cst_162 = arith.constant 0.000000e+00 : f32
    %387 = vector.shape_cast %386 : vector<3x1xi1> to vector<3x1xi1>
    %388 = vector.broadcast %387 : vector<3x1xi1> to vector<3x32xi1>
    %389 = vector.broadcast %cst_162 : f32 to vector<3x32xf32>
    %390 = arith.select %388, %381, %389 : vector<3x32xi1>, vector<3x32xf32>
    %c0_163 = arith.constant 0 : index
    %c0_164 = arith.constant 0 : index
    %c0_165 = arith.constant 0 : index
    %391 = vector.load %arg21[%c0_163, %c0_164, %c0_165] : memref<1x3x32xf32, #tpu.memory_space<vmem>>, vector<1x3x32xf32>
    %392 = vector.shape_cast %391 : vector<1x3x32xf32> to vector<3x32xf32>
    %393 = vector.shape_cast %390 : vector<3x32xf32> to vector<1x3x32xf32>
    tpu.vector_store %arg21[%c0_163, %c0_164, %c0_165], %393 {strides = array<i32>} : memref<1x3x32xf32, #tpu.memory_space<vmem>>, vector<1x3x32xf32>,
    return
  }
  func.func @transform_0(%arg0: i32) -> i32 {
    %c0_i32 = arith.constant 0 : i32
    %c0_i32_0 = arith.constant 0 : i32
    return %c0_i32 : i32
  }
  func.func @transform_1(%arg0: i32) -> (i32, i32) {
    %c0_i32 = arith.constant 0 : i32
    %c0_i32_0 = arith.constant 0 : i32
    %c0_i32_1 = arith.constant 0 : i32
    return %c0_i32, %c0_i32_0 : i32, i32
  }
  func.func @transform_2(%arg0: i32) -> (i32, i32, i32) {
    %c0_i32 = arith.constant 0 : i32
    %c0_i32_0 = arith.constant 0 : i32
    %c0_i32_1 = arith.constant 0 : i32
    return %arg0, %c0_i32, %c0_i32_0 : i32, i32, i32
  }
  func.func @transform_3(%arg0: i32) -> (i32, i32, i32) {
    %c0_i32 = arith.constant 0 : i32
    %c0_i32_0 = arith.constant 0 : i32
    %c0_i32_1 = arith.constant 0 : i32
    return %arg0, %c0_i32, %c0_i32_0 : i32, i32, i32
  }
  func.func @transform_4(%arg0: i32) -> (i32, i32, i32) {
    %c0_i32 = arith.constant 0 : i32
    %c0_i32_0 = arith.constant 0 : i32
    %c0_i32_1 = arith.constant 0 : i32
    return %arg0, %c0_i32, %c0_i32_0 : i32, i32, i32
  }
  func.func @transform_5(%arg0: i32) -> (i32, i32, i32) {
    %c0_i32 = arith.constant 0 : i32
    %c0_i32_0 = arith.constant 0 : i32
    %c0_i32_1 = arith.constant 0 : i32
    return %arg0, %c0_i32, %c0_i32_0 : i32, i32, i32
  }
  func.func @transform_6(%arg0: i32) -> (i32, i32) {
    %c0_i32 = arith.constant 0 : i32
    %c0_i32_0 = arith.constant 0 : i32
    %c0_i32_1 = arith.constant 0 : i32
    return %c0_i32, %c0_i32_0 : i32, i32
  }
  func.func @transform_7(%arg0: i32) -> (i32, i32) {
    %c0_i32 = arith.constant 0 : i32
    %c0_i32_0 = arith.constant 0 : i32
    %c0_i32_1 = arith.constant 0 : i32
    return %c0_i32, %c0_i32_0 : i32, i32
  }
  func.func @transform_8(%arg0: i32) -> (i32, i32, i32) {
    %c0_i32 = arith.constant 0 : i32
    %c0_i32_0 = arith.constant 0 : i32
    %c0_i32_1 = arith.constant 0 : i32
    %c0_i32_2 = arith.constant 0 : i32
    return %c0_i32, %c0_i32_0, %c0_i32_1 : i32, i32, i32
  }
  func.func @transform_9(%arg0: i32) -> (i32, i32, i32) {
    %c0_i32 = arith.constant 0 : i32
    %c0_i32_0 = arith.constant 0 : i32
    %c0_i32_1 = arith.constant 0 : i32
    %c0_i32_2 = arith.constant 0 : i32
    return %c0_i32, %c0_i32_0, %c0_i32_1 : i32, i32, i32
  }
  func.func @transform_10(%arg0: i32) -> (i32, i32, i32) {
    %c0_i32 = arith.constant 0 : i32
    %c0_i32_0 = arith.constant 0 : i32
    %c0_i32_1 = arith.constant 0 : i32
    %c0_i32_2 = arith.constant 0 : i32
    return %c0_i32, %c0_i32_0, %c0_i32_1 : i32, i32, i32
  }
  func.func @transform_11(%arg0: i32) -> (i32, i32, i32) {
    %c0_i32 = arith.constant 0 : i32
    %c0_i32_0 = arith.constant 0 : i32
    %c0_i32_1 = arith.constant 0 : i32
    %c0_i32_2 = arith.constant 0 : i32
    return %c0_i32, %c0_i32_0, %c0_i32_1 : i32, i32, i32
  }
  func.func @transform_12(%arg0: i32) -> (i32, i32, i32) {
    %c0_i32 = arith.constant 0 : i32
    %c0_i32_0 = arith.constant 0 : i32
    %c0_i32_1 = arith.constant 0 : i32
    %c0_i32_2 = arith.constant 0 : i32
    return %c0_i32, %c0_i32_0, %c0_i32_1 : i32, i32, i32
  }
  func.func @transform_13(%arg0: i32) -> (i32, i32, i32) {
    %c0_i32 = arith.constant 0 : i32
    %c0_i32_0 = arith.constant 0 : i32
    %c0_i32_1 = arith.constant 0 : i32
    %c0_i32_2 = arith.constant 0 : i32
    return %c0_i32, %c0_i32_0, %c0_i32_1 : i32, i32, i32
  }
  func.func @transform_14(%arg0: i32) -> (i32, i32, i32) {
    %c0_i32 = arith.constant 0 : i32
    %c0_i32_0 = arith.constant 0 : i32
    %c0_i32_1 = arith.constant 0 : i32
    %c0_i32_2 = arith.constant 0 : i32
    return %c0_i32, %c0_i32_0, %c0_i32_1 : i32, i32, i32
  }
  func.func @transform_15(%arg0: i32) -> (i32, i32, i32) {
    %c0_i32 = arith.constant 0 : i32
    %c0_i32_0 = arith.constant 0 : i32
    %c0_i32_1 = arith.constant 0 : i32
    %c0_i32_2 = arith.constant 0 : i32
    return %c0_i32, %c0_i32_0, %c0_i32_1 : i32, i32, i32
  }
  func.func @transform_16(%arg0: i32) -> (i32, i32, i32) {
    %c0_i32 = arith.constant 0 : i32
    %c0_i32_0 = arith.constant 0 : i32
    %c0_i32_1 = arith.constant 0 : i32
    %c0_i32_2 = arith.constant 0 : i32
    return %c0_i32, %c0_i32_0, %c0_i32_1 : i32, i32, i32
  }
  func.func @transform_17(%arg0: i32) -> (i32, i32, i32) {
    %c0_i32 = arith.constant 0 : i32
    %c0_i32_0 = arith.constant 0 : i32
    %c0_i32_1 = arith.constant 0 : i32
    %c0_i32_2 = arith.constant 0 : i32
    return %c0_i32, %c0_i32_0, %c0_i32_1 : i32, i32, i32
  }
  func.func @transform_18(%arg0: i32) -> (i32, i32, i32) {
    %c0_i32 = arith.constant 0 : i32
    %c0_i32_0 = arith.constant 0 : i32
    %c0_i32_1 = arith.constant 0 : i32
    %c0_i32_2 = arith.constant 0 : i32
    return %c0_i32, %c0_i32_0, %c0_i32_1 : i32, i32, i32
  }
  func.func @transform_19(%arg0: i32) -> (i32, i32, i32) {
    %c0_i32 = arith.constant 0 : i32
    %c0_i32_0 = arith.constant 0 : i32
    %c0_i32_1 = arith.constant 0 : i32
    %c0_i32_2 = arith.constant 0 : i32
    return %c0_i32, %c0_i32_0, %c0_i32_1 : i32, i32, i32
  }
  func.func @transform_20(%arg0: i32) -> (i32, i32, i32) {
    %c0_i32 = arith.constant 0 : i32
    %c0_i32_0 = arith.constant 0 : i32
    %c0_i32_1 = arith.constant 0 : i32
    return %arg0, %c0_i32, %c0_i32_0 : i32, i32, i32
  }
}

</mosaic_0001>

<bundles_post_ra>
// kernel: bert_forward.1
= control target key start
LH: loop header
LB: loop body
LE: loop exit
PB: predicated region body
PF: predicated region fallthrough
CT: control target
= control target key end

     0   :  { %s4078_s0 = inlined_call_operand.vmem [shape: f32[3], index: 0, kind: input, shape index: {}]   ;;  %s4079_s1 = inlined_call_operand.vmem [shape: s32[2,1], index: 1, kind: input, shape index: {}]   ;;  %s4080_s2 = inlined_call_operand.vmem [shape: f32[2,8,32], index: 2, kind: input, shape index: {}]   ;;  %s4081_s3 = inlined_call_operand.vmem [shape: f32[2,1,8], index: 3, kind: input, shape index: {}]   ;;  %s4082_s4 = inlined_call_operand.vmem [shape: s32[2,3,1], index: 4, kind: input, shape index: {}]   ;;  %s4083_s5 = inlined_call_operand.vmem [shape: s32[2,3,1], index: 5, kind: input, shape index: {}]   ;;  %s4084_s6 = inlined_call_operand.vmem [shape: f32[1,32], index: 6, kind: input, shape index: {}]   ;;  %s4085_s7 = inlined_call_operand.vmem [shape: f32[1,32], index: 7, kind: input, shape index: {}]   ;;  %s4086_s8 = inlined_call_operand.vmem [shape: bf16[2,32,96], index: 8, kind: input, shape index: {}]   ;;  %s4087_s9 = inlined_call_operand.vmem [shape: f32[2,1,96], index: 9, kind: input, shape index: {}]   ;;  %s4088_s10 = inlined_call_operand.vmem [shape: bf16[2,32,32], index: 10, kind: input, shape index: {}]   ;;  %s4089_s11 = inlined_call_operand.vmem [shape: f32[2,1,32], index: 11, kind: input, shape index: {}]   ;;  %s4090_s12 = inlined_call_operand.vmem [shape: f32[2,1,32], index: 12, kind: input, shape index: {}]   ;;  %s4091_s13 = inlined_call_operand.vmem [shape: f32[2,1,32], index: 13, kind: input, shape index: {}]   ;;  %s4092_s14 = inlined_call_operand.vmem [shape: bf16[2,32,64], index: 14, kind: input, shape index: {}]   ;;  %s4093_s15 = inlined_call_operand.vmem [shape: f32[2,1,64], index: 15, kind: input, shape index: {}]   ;;  %s4094_s16 = inlined_call_operand.vmem [shape: bf16[2,64,32], index: 16, kind: input, shape index: {}]   ;;  %s4095_s17 = inlined_call_operand.vmem [shape: f32[2,1,32], index: 17, kind: input, shape index: {}]   ;;  %s4096_s18 = inlined_call_operand.vmem [shape: f32[2,1,32], index: 18, kind: input, shape index: {}]   ;;  %s4097_s19 = inlined_call_operand.vmem [shape: f32[2,1,32], index: 19, kind: input, shape index: {}]   ;;  %s4098_s20 = inlined_call_operand.vmem [shape: f32[2,3,32], index: 20, kind: output, shape index: {}]  }
   0x1   :  { %4110 = sst [smem:[#allocation8_spill]] %s4078_s0 }
   0x2   :  { %4111 = sst [smem:[#allocation9_spill]] %s4079_s1 }
   0x3   :  { %4112 = sst [smem:[#allocation10_spill]] %s4080_s2 }
   0x4   :  { %4113 = sst [smem:[#allocation11_spill]] %s4081_s3 }
   0x5   :  { %4114 = sst [smem:[#allocation12_spill]] %s4082_s4 }
   0x6   :  { %25 = vsyncpa [#allocation3], 0 }
   0x7   :  { %26 = vsyncpa [#allocation5], 0  ;;  %s3653_s1 = smov 0  }
   0x8 LB: > { %s3659_s22 = sadd.s32 4294967295, %s3527_s1   ;;  %p3032_p0 = scmp.ge.s32.totalorder %s3527_s1, 1  ;;  %s3527_s1 = sphi %s3653_s1, %s32_s1  }
   0x9   : > { %p503_p1 = scmp.lt.s32.totalorder %s3527_s1, 3  ;;  %s4115_s2 = sld [smem:[#allocation8_spill]] }
   0xa   : > { %p4099_p3 = scmp.eq.s32.totalorder %s3659_s22, 0  ;;  %s4117_s28 = sld [smem:[#allocation9_spill]] }
   0xb   : > { %p3666_p2 = pnand %p3032_p0, %p503_p1 }
   0xd   : > { %s4116_s3 = scalar_select %p3666_p2, 1, 0 }
   0xe   : > { %p3377_p4 = pneg %p3666_p2 }
   0xf   : > { %s516_s25 = sshll.u32 %s4115_s2, 4  ;;  %s517_s25 = int_to_ptr.vmem [resolvable:$true] %s516_s25 }
  0x10   : > { %s527_s4 = sshll.u32 %s4117_s28, 4  ;;  %p3678_p5 = pnand %p4099_p3, %p3377_p4  ;;  %s528_s4 = int_to_ptr.vmem [resolvable:$true] %s527_s4 }
  0x11   : > { %s3483_s30 = scalar_lea.vmem %s517_s25, 16  ;;  %p3491_p10 = scmp.lt.s32.totalorder %s517_s25, %s517_s25 }
  0x12   : > { %p3484_p6 = scmp.ne.s32.totalorder %s517_s25, %s3483_s30  ;;  %p3485_p7 = pneg %p3678_p5 }
  0x13   : > { %p3492_p11 = scmp.lt.s32.totalorder %s3483_s30, %s3483_s30 }
  0x14   : > { %p3486_p8 = pnand %p3485_p7, %p3484_p6 }
  0x15   : > { %p3493_p12 = por %p3492_p11, %p3491_p10 }
  0x16   : > { %p3487_p9 = pneg %p3486_p8 }
  0x18   : > { %p3494_p13 = pnand %p3493_p12, %p3487_p9 }
  0x1a   : > { %3497 = shalt.err (!%p3494_p13)
}
  0x1b   : > { %s3529_s0 = smov [#allocation2]   ;;  %s3498_s21 = scalar_lea.vmem %s528_s4, 32 }
  0x1c   : > { %3380 = dma.vmem_to_smem (!%p3678_p5), %s517_s25, 16, %s3529_s0, [#allocation3]  }
  0x1d   : > { %p3499_p0 = scmp.ne.s32.totalorder %s528_s4, %s3498_s21  ;;  %p3506_p3 = scmp.lt.s32.totalorder %s528_s4, %s528_s4 }
  0x1e   : > { %p3507_p2 = scmp.lt.s32.totalorder %s3498_s21, %s3498_s21 }
  0x1f   : > { %p3501_p1 = pnand %p3499_p0, %p3485_p7 }
  0x20   : > { %p3508_p6 = por %p3507_p2, %p3506_p3 }
  0x21   : > { %p3502_p4 = pneg %p3501_p1 }
  0x23   : > { %p3509_p8 = pnand %p3508_p6, %p3502_p4 }
  0x25   : > { %3512 = shalt.err (!%p3509_p8)
}
  0x26   : > { %s3530_s23 = smov [#allocation4]   ;;  %p4119_p9 = scmp.ne.s32.totalorder %s4116_s3, 0 }
  0x27   : > { %3383 = dma.vmem_to_smem (!%p3678_p5), %s528_s4, 32, %s3530_s23, [#allocation5]  }
  0x28   : > { %609 = sbr.rel (%p4119_p9) target bundleno = 6136 (0x17f8), region = 100  ;;  %p4120_p10 = scmp.eq.s32.totalorder (!%p4119_p9), %s3659_s22, 0 }
  0x2f   : > { %3518 = dma.done.wait (%p4120_p10), [#allocation3], 16   ;;  %p4121_p11 = pmov %p4120_p10 }
  0x30   : > { %p4122_p7 = pmov %p4120_p10 }
  0x31   : > { %3520 = vsyncadd (%p4121_p11), [#allocation3], 4294967280 }
  0x32   : > { %3522 = dma.done.wait (%p4122_p7), [#allocation5], 32   ;;  %p4123_p2 = pmov %p4122_p7 }
  0x34   : > { %3524 = vsyncadd (%p4123_p2), [#allocation5], 4294967264 }
  0x35   : > { %619 = sfence }
  0x36   : > { %p681_p3 = scmp.lt.s32.totalorder %s3659_s22, 1  ;;  %vm704_vm0 = vcmask 261120   ;;  %s4124_s26 = sld [smem:[#allocation10_spill]]  ;;  %v3417_v7 = vld [vmem:[%s4086_s8] sm:$0xff]   ;;  %v3531_v8 = vmov 0.0   ;;  %v3418_v9 = vld [vmem:[%s4086_s8 + $0x8] sm:$0xff]  }
  0x37   : > { %3212 = vmatprep.subr.bf16.mxu0 %v3531_v8  ;;  %3225 = vmatprep.subr.mxu1 %v3531_v8  ;;  %vm3532_vm1 = vmmov 0   ;;  %v3043_v14 = vld [vmem:[%s4084_s6] ss:$0 sm:$0xff]  ;;  %s3535_s28 = smov 88   ;;  %s3536_s4 = smov 120   ;;  %vm813_vm2 = vcmask 64512  }
  0x38   : > { %s3700_s24 = scalar_select %p681_p3, %s3659_s22, 1  ;;  %3213 = vmatpush3.bf16.msra.mxu0 %v3417_v7  ;;  %3216 = vmatprep.mubr.msk.bf16.mxu0 %vm3532_vm1, %v3531_v8  ;;  %v3044_v16 = vld [vmem:[%s4085_s7] ss:$0 sm:$0xff]  ;;  %vm1483_vm3 = vcmask 130048   ;;  %vm1485_vm4 = vcmask 195584   ;;  %vm1700_vm5 = vcmask 523264  }
  0x39   : > { %3214 = vmatprep.subr.bf16.mxu0 %v3531_v8  ;;  %3227 = vmatprep.mubr.msk.f32.mxu1 %vm3532_vm1, %v3531_v8  ;;  %v3045_v20 = vld [vmem:[%s4087_s9] ss:$0 sm:$0xff]  ;;  %s4125_s0 = sld [smem:[#allocation11_spill]]  ;;  %s3537_s23 = smov 80   ;;  %vm2920_vm9 = vcmask 256000  }
  0x3a   : > { %s3039_s2 = sshll.u32 %s3700_s24, 3  ;;  %s4105_s25 = smov 72  }
  0x3b   : > { %s4109_s3 = smov 104   ;;  %s4103_s29 = smov 48  }
  0x3c   : > { %s684_s27 = scalar_lea.vmem %s4124_s26, %s3039_s2  ;;  %3215 = vmatpush3.bf16.msra.mxu0 %v3418_v9  ;;  %s4104_s26 = smov 64  }
  0x3d   : > { %v701_v0 = vld [vmem:[%s684_s27] sm:$0xff]  ;;  %3220 = vmatprep.subr.mxu0 %v3531_v8  ;;  %s3534_s27 = smov 96   ;;  %s3538_s2 = smov 112  }
  0x3e   : > { %v705_v1 = vsel %vm704_vm0, %v701_v0, 0.0  ;;  %s4102_s30 = smov 40  }
  0x3f   : > { %706 = vadd.xlane.f32.xlu0 %v705_v1  ;;  %s687_s21 = scalar_lea.vmem %s4125_s0, %s3700_s24  ;;  %s4101_s0 = smov 56  }
  0x40   : > { %v3759_v28 = vld [vmem:[%s687_s21] ss:$0 sm:$0xff] }
  0xcc   : > { %v707_v2 = vpop.xlane.xlu0 %706 }
  0xcd   : > { %v709_v3 = vmul.f32 0.03125, %v707_v2 }
  0xcf   : > { %v710_v4 = vsub.f32 %v701_v0, %v709_v3 }
  0xd1   : > { %v711_v5 = vmul.f32 %v710_v4, %v710_v4 }
  0xd3   : > { %v712_v6 = vsel %vm704_vm0, %v711_v5, 0.0 }
  0xd4   : > { %713 = vadd.xlane.f32.xlu0 %v712_v6 }
 0x161   : > { %v714_v10 = vpop.xlane.xlu0 %713 }
 0x162   : > { %v715_v11 = vmul.f32 0.03125, %v714_v10 }
 0x164   : > { %v716_v12 = vadd.f32 1e-12, %v715_v11 }
 0x166   : > { %3437 = vrsqrt.f32 %v716_v12 }
 0x170   : > { %v3438_v13 = vpop.eup %3437 }
 0x171   : > { %v718_v15 = vmul.f32 %v3438_v13, %v710_v4 }
 0x173   : > { %v725_v17 = vmul.f32 %v3043_v14, %v718_v15 }
 0x175   : > { %v3728_v18 = vadd.f32 %v3044_v16, %v725_v17 }
 0x177   : > { %v737_v19 = vpack.c.bf16 %v3728_v18, %v3728_v18 }
 0x179   : > { %3217 = vmatmul.mubr.msk.bf16.vlgmr.msra.gmra.mrb[0].mxu0 %vm704_vm0, %v737_v19 }
 0x17a   : > { %3222 = vmatprep.mubr.msk.f32.mxu0 %vm3532_vm1, %v3531_v8 }
 0x24c   : > { %v798_v21 = vpop.f32.mrb[0].mxu0 }
 0x24d   : > { %v3738_v22 = vadd.f32 %v3045_v20, %v798_v21  ;;  %v3218_v23 = vpop.f32.mrb[1].mxu0 }
 0x24e   : > { %v801_v24 = vpop.f32.mrb[2].mxu0 }
 0x24f   : > { %899 = vrot.lane.b32.xlu0 %v3738_v22, %s4104_s26  ;;  %811 = vrot.lane.b32.xlu1 %v3738_v22, %s3534_s27  ;;  %v3219_v25 = vpop.f32.mrb[3].mxu0  ;;  %s4108_s26 = smov 8  }
 0x253   : > { %977 = vrot.lane.b32.xlu0 %v3738_v22, %s3535_s28 }
 0x257   : > { %975 = vrot.lane.b32.xlu0 %v3738_v22, %s3536_s4 }
 0x2c1   : > { %v900_v26 = vpop.permute.xlu0 %899  ;;  %v812_v27 = vpop.permute.xlu1 %811 }
 0x2c2   : > { %3221 = vmatpush3.xpose.msk.msra.mxu0 %vm813_vm2, %v812_v27  ;;  %3226 = vmatpush3.msra.mxu1 %v900_v26  ;;  %v3419_v26 = vld [vmem:[%s4088_s10] sm:$0xff]   ;;  %v3420_v27 = vld [vmem:[%s4088_s10 + $0x8] sm:$0xff]  }
 0x2c3   : > { %3230 = vmatprep.subr.mxu1 %v3531_v8  ;;  %3235 = vmatprep.subr.mxu0 %v3531_v8 }
 0x2c5   : > { %3223 = vmatmul.mubr.msk.f32.vlgmr.msra.gmra.mrb[4].mxu0 %vm813_vm2, %v3738_v22  ;;  %v978_v38 = vpop.permute.xlu0 %977 }
 0x2c6   : > { %3237 = vmatprep.mubr.msk.f32.mxu0 %vm3532_vm1, %v3531_v8 }
 0x2c9   : > { %v976_v39 = vpop.permute.xlu0 %975 }
 0x398   : > { %v884_v29 = vpop.f32.mrb[4].mxu0 }
 0x399   : > { %v885_v30 = vadd.f32 %v3759_v28, %v884_v29  ;;  %v3224_v31 = vpop.f32.mrb[5].mxu0 }
 0x39b   : > { %v888_v32 = vsel %vm813_vm2, %v885_v30, -inf }
 0x39c   : > { %889 = vmax.xlane.f32.xlu1 %v888_v32 }
 0x3ad   : > { %1142 = vrot.lane.b32.xlu1 %v3738_v22, %s3537_s23 }
 0x429   : > { %v890_v33 = vpop.xlane.xlu1 %889 }
 0x42a   : > { %v891_v34 = vsub.f32 %v885_v30, %v890_v33 }
 0x42c   : > { %v892_v35 = vmul.f32 1.442695, %v891_v34 }
 0x42d   : > { %v1143_v44 = vpop.permute.xlu1 %1142 }
 0x42e   : > { %3439 = vpow2.f32 %v892_v35 }
 0x438   : > { %v3440_v36 = vpop.eup %3439 }
 0x439   : > { %v894_v37 = vsel %vm813_vm2, %v3440_v36, 0.0 }
 0x43a   : > { %895 = vadd.xlane.f32.xlu0 %v894_v37 }
 0x450   : > { %1140 = vrot.lane.b32.xlu0 %v3738_v22, %s3538_s2 }
 0x454   : > { %1307 = vrot.lane.b32.xlu0 %v3738_v22, %s4105_s25  ;;  %s4107_s25 = smov 16  }
 0x458   : > { %1305 = vrot.lane.b32.xlu0 %v3738_v22, %s4109_s3  ;;  %s733_s3 = sld [smem:[#allocation2]] }
 0x4c7   : > { %v896_v40 = vpop.xlane.xlu0 %895 }
 0x4c8   : > { %3441 = vrcp.f32 %v896_v40 }
 0x4cb   : > { %v1141_v43 = vpop.permute.xlu0 %1140 }
 0x4cf   : > { %v1308_v45 = vpop.permute.xlu0 %1307 }
 0x4d2   : > { %v3442_v41 = vpop.eup %3441 }
 0x4d3   : > { %v898_v42 = vmul.f32 %v3442_v41, %v3440_v36  ;;  %v1306_v46 = vpop.permute.xlu0 %1305 }
 0x4d5   : > { %3228 = vmatmul.mubr.msk.f32.vlgmr.msra.gmra.mrb[0].mxu1 %vm813_vm2, %v898_v42  ;;  %v3062_v42 = vld [vmem:[%s4089_s11] ss:$0 sm:$0xff] }
 0x4d6   : > { %3231 = vmatpush3.xpose.msk.msra.mxu1 %vm813_vm2, %v978_v38  ;;  %3232 = vmatprep.mubr.msk.f32.mxu1 %vm3532_vm1, %v3531_v8 }
 0x4d7   : > { %3240 = vmatprep.subr.mxu1 %v3531_v8 }
 0x4d9   : > { %3233 = vmatmul.mubr.msk.f32.vlgmr.msra.gmra.mrb[2].mxu1 %vm813_vm2, %v976_v39 }
 0x4da   : > { %3241 = vmatpush3.xpose.msk.msra.mxu1 %vm813_vm2, %v1143_v44  ;;  %3242 = vmatprep.mubr.msk.f32.mxu1 %vm3532_vm1, %v3531_v8 }
 0x4db   : > { %3250 = vmatprep.subr.mxu1 %v3531_v8 }
 0x4dd   : > { %3243 = vmatmul.mubr.msk.f32.vlgmr.msra.gmra.mrb[4].mxu1 %vm813_vm2, %v1141_v43 }
 0x4de   : > { %3251 = vmatpush3.xpose.msk.msra.mxu1 %vm813_vm2, %v1308_v45  ;;  %3252 = vmatprep.mubr.msk.f32.mxu1 %vm3532_vm1, %v3531_v8 }
 0x4df   : > { %3260 = vmatprep.subr.bf16.mxu1 %v3531_v8 }
 0x4e1   : > { %3253 = vmatmul.mubr.msk.f32.vlgmr.msra.gmra.mrb[6].mxu1 %vm813_vm2, %v1306_v46 }
 0x4e2   : > { %3264 = vmatprep.mubr.msk.bf16.mxu1 %vm3532_vm1, %v3531_v8  ;;  %3261 = vmatpush3.bf16.msra.mxu1 %v3419_v26 }
 0x4e3   : > { %3262 = vmatprep.subr.bf16.mxu1 %v3531_v8 }
 0x4e6   : > { %3263 = vmatpush3.bf16.msra.mxu1 %v3420_v27 }
 0x4e7   : > { %3276 = vmatprep.subr.bf16.mxu1 %v3531_v8 }
 0x5a8   : > { %v3790_v47 = vpop.f32.mrb[0].mxu1 }
 0x5a9   : > { %v3229_v48 = vpop.f32.mrb[1].mxu1 }
 0x5ac   : > { %v1049_v49 = vpop.f32.mrb[2].mxu1 }
 0x5ad   : > { %v1050_v50 = vadd.f32 %v3759_v28, %v1049_v49  ;;  %v3234_v51 = vpop.f32.mrb[3].mxu1 }
 0x5af   : > { %v1053_v52 = vsel %vm813_vm2, %v1050_v50, -inf }
 0x5b0   : > { %1054 = vmax.xlane.f32.xlu0 %v1053_v52  ;;  %v1214_v53 = vpop.f32.mrb[4].mxu1 }
 0x5b1   : > { %v1215_v54 = vadd.f32 %v3759_v28, %v1214_v53  ;;  %v3244_v55 = vpop.f32.mrb[5].mxu1 }
 0x5b2   : > { %v3421_v55 = vld [vmem:[%s4092_s14] sm:$0xff]  }
 0x5b3   : > { %v1218_v56 = vsel %vm813_vm2, %v1215_v54, -inf }
 0x5b4   : > { %1219 = vmax.xlane.f32.xlu1 %v1218_v56  ;;  %v1379_v57 = vpop.f32.mrb[6].mxu1  ;;  %v3422_v56 = vld [vmem:[%s4092_s14 + $0x8] sm:$0xff]  }
 0x5b5   : > { %v1380_v58 = vadd.f32 %v3759_v28, %v1379_v57  ;;  %v3254_v59 = vpop.f32.mrb[7].mxu1 }
 0x5b7   : > { %v1383_v60 = vsel %vm813_vm2, %v1380_v58, -inf }
 0x5b8   : > { %1384 = vmax.xlane.f32.xlu0 %v1383_v60 }
 0x5c5   : > { %1229 = vrot.lane.b32.xlu1 %v3738_v22, %s4103_s29  ;;  %s4132_s29 = smov 8  }
 0x63d   : > { %v1055_v61 = vpop.xlane.xlu0 %1054 }
 0x63e   : > { %v1056_v62 = vsub.f32 %v1050_v50, %v1055_v61  ;;  %v3066_v61 = vld [vmem:[%s4090_s12] ss:$0 sm:$0xff] }
 0x640   : > { %v1057_v63 = vmul.f32 1.442695, %v1056_v62 }
 0x641   : > { %v1220_v0 = vpop.xlane.xlu1 %1219 }
 0x642   : > { %3443 = vpow2.f32 %v1057_v63  ;;  %v1221_v1 = vsub.f32 %v1215_v54, %v1220_v0  ;;  %v3067_v63 = vld [vmem:[%s4091_s13] ss:$0 sm:$0xff] }
 0x644   : > { %v1222_v2 = vmul.f32 1.442695, %v1221_v1 }
 0x645   : > { %v1385_v3 = vpop.xlane.xlu0 %1384  ;;  %v1230_v14 = vpop.permute.xlu1 %1229 }
 0x646   : > { %3445 = vpow2.f32 %v1222_v2  ;;  %v1386_v4 = vsub.f32 %v1380_v58, %v1385_v3  ;;  %v3423_v3 = vld [vmem:[%s4094_s16] sm:$0xff]  }
 0x648   : > { %v1387_v5 = vmul.f32 1.442695, %v1386_v4  ;;  %v3424_v4 = vld [vmem:[%s4094_s16 + $0x8] sm:$0xff]  }
 0x64a   : > { %3447 = vpow2.f32 %v1387_v5  ;;  %v3425_v5 = vld [vmem:[%s4094_s16 + $0x10] sm:$0xff]  }
 0x64c   : > { %v3444_v6 = vpop.eup %3443 }
 0x64d   : > { %v1059_v7 = vsel %vm813_vm2, %v3444_v6, 0.0 }
 0x64e   : > { %1060 = vadd.xlane.f32.xlu0 %v1059_v7  ;;  %v3068_v7 = vld [vmem:[%s4093_s15] ss:$0 sm:$0xff] }
 0x650   : > { %v3446_v9 = vpop.eup %3445 }
 0x651   : > { %v1224_v10 = vsel %vm813_vm2, %v3446_v9, 0.0 }
 0x652   : > { %1225 = vadd.xlane.f32.xlu0 %v1224_v10 }
 0x654   : > { %v3448_v11 = vpop.eup %3447 }
 0x655   : > { %v1389_v12 = vsel %vm813_vm2, %v3448_v11, 0.0 }
 0x656   : > { %1390 = vadd.xlane.f32.xlu1 %v1389_v12 }
 0x667   : > { %1394 = vrot.lane.b32.xlu1 %v3738_v22, %s4102_s30  ;;  %s4126_s30 = smov 104  }
 0x668   : > { %1064 = vrot.lane.b32.xlu0 %v3738_v22, %s4101_s0  ;;  %s4106_s0 = smov 24  }
 0x6db   : > { %v1061_v13 = vpop.xlane.xlu0 %1060 }
 0x6dc   : > { %3449 = vrcp.f32 %v1061_v13 }
 0x6df   : > { %v1226_v15 = vpop.xlane.xlu0 %1225 }
 0x6e0   : > { %3451 = vrcp.f32 %v1226_v15 }
 0x6e3   : > { %v1391_v16 = vpop.xlane.xlu1 %1390  ;;  %v1065_v17 = vpop.permute.xlu0 %1064 }
 0x6e4   : > { %3453 = vrcp.f32 %v1391_v16  ;;  %3236 = vmatpush3.msra.mxu0 %v1065_v17 }
 0x6e5   : > { %3245 = vmatprep.subr.mxu0 %v3531_v8 }
 0x6e6   : > { %v3450_v19 = vpop.eup %3449 }
 0x6e7   : > { %v1063_v20 = vmul.f32 %v3450_v19, %v3444_v6  ;;  %v1395_v23 = vpop.permute.xlu1 %1394  ;;  %v3426_v6 = vld [vmem:[%s4094_s16 + $0x18] sm:$0xff]  }
 0x6e9   : > { %3238 = vmatmul.mubr.msk.f32.vlgmr.msra.gmra.mrb[6].mxu0 %vm813_vm2, %v1063_v20 }
 0x6ea   : > { %v3452_v21 = vpop.eup %3451  ;;  %3246 = vmatpush3.msra.mxu0 %v1230_v14  ;;  %3247 = vmatprep.mubr.msk.f32.mxu0 %vm3532_vm1, %v3531_v8 }
 0x6eb   : > { %v1228_v22 = vmul.f32 %v3452_v21, %v3446_v9  ;;  %3255 = vmatprep.subr.mxu0 %v3531_v8 }
 0x6ed   : > { %3248 = vmatmul.mubr.msk.f32.vlgmr.msra.gmra.mrb[8].mxu0 %vm813_vm2, %v1228_v22 }
 0x6ee   : > { %v3454_v24 = vpop.eup %3453  ;;  %3256 = vmatpush3.msra.mxu0 %v1395_v23  ;;  %3257 = vmatprep.mubr.msk.f32.mxu0 %vm3532_vm1, %v3531_v8 }
 0x6ef   : > { %v1393_v25 = vmul.f32 %v3454_v24, %v3448_v11  ;;  %3268 = vmatprep.subr.bf16.mxu0 %v3531_v8 }
 0x6f1   : > { %3258 = vmatmul.mubr.msk.f32.vlgmr.msra.gmra.mrb[10].mxu0 %vm813_vm2, %v1393_v25  ;;  %v3072_v25 = vld [vmem:[%s4095_s17] ss:$0 sm:$0xff] }
 0x6f2   : > { %3272 = vmatprep.mubr.msk.bf16.mxu0 %vm3532_vm1, %v3531_v8  ;;  %3269 = vmatpush3.bf16.msra.mxu0 %v3421_v55 }
 0x6f3   : > { %3270 = vmatprep.subr.bf16.mxu0 %v3531_v8 }
 0x6f6   : > { %3271 = vmatpush3.bf16.msra.mxu0 %v3422_v56 }
 0x6f7   : > { %3288 = vmatprep.subr.bf16.mxu0 %v3531_v8 }
 0x7bc   : > { %v1136_v29 = vpop.f32.mrb[6].mxu0 }
 0x7bd   : > { %1471 = vrot.lane.b32.xlu1 %v1136_v29, %s4108_s26  ;;  %v3239_v30 = vpop.f32.mrb[7].mxu0  ;;  %s4127_s26 = smov 72  }
 0x7c0   : > { %v1301_v31 = vpop.f32.mrb[8].mxu0 }
 0x7c1   : > { %1475 = vrot.lane.b32.xlu0 %v1301_v31, %s4107_s25  ;;  %v3249_v32 = vpop.f32.mrb[9].mxu0  ;;  %s3143_s25 = sld [smem:[#allocation2 + $0x2]] }
 0x7c4   : > { %v1466_v33 = vpop.f32.mrb[10].mxu0 }
 0x7c5   : > { %1479 = vrot.lane.b32.xlu1 %v1466_v33, %s4106_s0  ;;  %v3259_v34 = vpop.f32.mrb[11].mxu0  ;;  %s4133_s0 = smov 16  }
 0x82f   : > { %v1472_v35 = vpop.permute.xlu1 %1471 }
 0x830   : > { %v1482_v37 = vsel %vm813_vm2, %v3790_v47, %v1472_v35 }
 0x833   : > { %v1476_v36 = vpop.permute.xlu0 %1475 }
 0x834   : > { %v1484_v38 = vsel %vm1483_vm3, %v1482_v37, %v1476_v36 }
 0x837   : > { %v1480_v39 = vpop.permute.xlu1 %1479 }
 0x838   : > { %v1486_v40 = vsel %vm1485_vm4, %v1484_v38, %v1480_v39  ;;  %v3427_v39 = vld [vmem:[%s4086_s8 + $0x10] sm:$0xff]  }
 0x839   : > { %v1487_v41 = vpack.c.bf16 %v1486_v40, %v1486_v40  ;;  %v3428_v40 = vld [vmem:[%s4086_s8 + $0x18] sm:$0xff]  }
 0x83b   : > { %3265 = vmatmul.mubr.msk.bf16.vlgmr.msra.gmra.mrb[8].mxu1 %vm704_vm0, %v1487_v41 }
 0x83c   : > { %3284 = vmatprep.mubr.msk.bf16.mxu1 %vm3532_vm1, %v3531_v8  ;;  %3277 = vmatpush3.bf16.msra.mxu1 %v3423_v3 }
 0x83d   : > { %3278 = vmatprep.subr.bf16.mxu1 %v3531_v8 }
 0x840   : > { %3279 = vmatpush3.bf16.msra.mxu1 %v3424_v4 }
 0x841   : > { %3280 = vmatprep.subr.bf16.mxu1 %v3531_v8 }
 0x844   : > { %3281 = vmatpush3.bf16.msra.mxu1 %v3425_v5 }
 0x845   : > { %3282 = vmatprep.subr.bf16.mxu1 %v3531_v8 }
 0x848   : > { %3283 = vmatpush3.bf16.msra.mxu1 %v3426_v6 }
 0x849   : > { %3306 = vmatprep.subr.mxu1 %v3531_v8 }
 0x90e   : > { %v1548_v43 = vpop.f32.mrb[8].mxu1 }
 0x90f   : > { %v1549_v44 = vadd.f32 %v3062_v42, %v1548_v43  ;;  %v3266_v45 = vpop.f32.mrb[9].mxu1 }
 0x910   : > { %v1551_v46 = vpop.f32.mrb[10].mxu1  ;;  %v3078_v45 = vld [vmem:[%s4096_s18] ss:$0 sm:$0xff] }
 0x911   : > { %v3267_v47 = vpop.f32.mrb[11].mxu1  ;;  %v1554_v48 = vadd.f32 %v1549_v44, %v3728_v18 }
 0x912   : > { %v3079_v47 = vld [vmem:[%s4097_s19] ss:$0 sm:$0xff] }
 0x913   : > { %v1557_v49 = vsel %vm704_vm0, %v1554_v48, 0.0 }
 0x914   : > { %1558 = vadd.xlane.f32.xlu0 %v1557_v49 }
 0x9a1   : > { %v1559_v50 = vpop.xlane.xlu0 %1558 }
 0x9a2   : > { %v1560_v51 = vmul.f32 0.03125, %v1559_v50 }
 0x9a4   : > { %v1561_v52 = vsub.f32 %v1554_v48, %v1560_v51  ;;  %v3086_v51 = vld [vmem:[%s4087_s9 + $0x1] ss:$0 sm:$0xff] }
 0x9a6   : > { %v1562_v53 = vmul.f32 %v1561_v52, %v1561_v52 }
 0x9a8   : > { %v1563_v54 = vsel %vm704_vm0, %v1562_v53, 0.0 }
 0x9a9   : > { %1564 = vadd.xlane.f32.xlu1 %v1563_v54 }
 0xa36   : > { %v1565_v57 = vpop.xlane.xlu1 %1564 }
 0xa37   : > { %v1566_v58 = vmul.f32 0.03125, %v1565_v57 }
 0xa39   : > { %v1567_v59 = vadd.f32 1e-12, %v1566_v58 }
 0xa3b   : > { %3455 = vrsqrt.f32 %v1567_v59 }
 0xa45   : > { %v3456_v60 = vpop.eup %3455 }
 0xa46   : > { %v1569_v62 = vmul.f32 %v3456_v60, %v1561_v52 }
 0xa48   : > { %v1576_v0 = vmul.f32 %v3066_v61, %v1569_v62 }
 0xa4a   : > { %v1583_v1 = vadd.f32 %v3067_v63, %v1576_v0 }
 0xa4c   : > { %v1584_v2 = vpack.c.bf16 %v1583_v1, %v1583_v1 }
 0xa4e   : > { %3273 = vmatmul.mubr.msk.bf16.vlgmr.msra.gmra.mrb[12].mxu0 %vm704_vm0, %v1584_v2 }
 0xa4f   : > { %3292 = vmatprep.mubr.msk.bf16.mxu0 %vm3532_vm1, %v3531_v8  ;;  %3289 = vmatpush3.bf16.msra.mxu0 %v3427_v39 }
 0xa50   : > { %3290 = vmatprep.subr.bf16.mxu0 %v3531_v8 }
 0xa53   : > { %3291 = vmatpush3.bf16.msra.mxu0 %v3428_v40 }
 0xa54   : > { %3296 = vmatprep.subr.mxu0 %v3531_v8 }
 0xb21   : > { %v1645_v9 = vpop.f32.mrb[12].mxu0 }
 0xb22   : > { %v1646_v10 = vadd.f32 %v3068_v7, %v1645_v9  ;;  %v3274_v11 = vpop.f32.mrb[13].mxu0 }
 0xb23   : > { %v1648_v12 = vpop.f32.mrb[14].mxu0 }
 0xb24   : > { %v1651_v13 = vmul.f32 %v1646_v10, %v1646_v10  ;;  %v3275_v14 = vpop.f32.mrb[15].mxu0 }
 0xb26   : > { %v1652_v15 = vmul.f32 %v1651_v13, %v1646_v10 }
 0xb28   : > { %v1653_v16 = vmul.f32 0.044715, %v1652_v15 }
 0xb2a   : > { %v1654_v17 = vadd.f32 %v1653_v16, %v1646_v10 }
 0xb2c   : > { %v1655_v19 = vmul.f32 0.7978846, %v1654_v17 }
 0xb2e   : > { %3457 = vtanh.f32 %v1655_v19 }
 0xb38   : > { %v3458_v20 = vpop.eup %3457 }
 0xb39   : > { %v1657_v21 = vadd.f32 1.0, %v3458_v20 }
 0xb3b   : > { %v1658_v22 = vmul.f32 0.5, %v1657_v21 }
 0xb3d   : > { %v1659_v23 = vmul.f32 %v1658_v22, %v1646_v10 }
 0xb3f   : > { %v1660_v24 = vpack.c.bf16 %v1659_v23, %v1659_v23 }
 0xb41   : > { %3285 = vmatmul.mubr.msk.bf16.vlgmr.msra.gmra.mrb[12].mxu1 %vm1700_vm5, %v1660_v24 }
 0xb42   : > { %3308 = vmatprep.mubr.msk.f32.mxu1 %vm3532_vm1, %v3531_v8 }
 0xc14   : > { %v1738_v26 = vpop.f32.mrb[12].mxu1 }
 0xc15   : > { %v1739_v27 = vadd.f32 %v3072_v25, %v1738_v26  ;;  %v3286_v29 = vpop.f32.mrb[13].mxu1 }
 0xc16   : > { %v1741_v30 = vpop.f32.mrb[14].mxu1 }
 0xc17   : > { %v3287_v31 = vpop.f32.mrb[15].mxu1  ;;  %v1744_v32 = vadd.f32 %v1739_v27, %v1583_v1 }
 0xc19   : > { %v1747_v33 = vsel %vm704_vm0, %v1744_v32, 0.0 }
 0xc1a   : > { %1748 = vadd.xlane.f32.xlu0 %v1747_v33 }
 0xca7   : > { %v1749_v34 = vpop.xlane.xlu0 %1748 }
 0xca8   : > { %v1750_v35 = vmul.f32 0.03125, %v1749_v34 }
 0xcaa   : > { %v1751_v36 = vsub.f32 %v1744_v32, %v1750_v35 }
 0xcac   : > { %v1752_v37 = vmul.f32 %v1751_v36, %v1751_v36 }
 0xcae   : > { %v1753_v38 = vsel %vm704_vm0, %v1752_v37, 0.0 }
 0xcaf   : > { %1754 = vadd.xlane.f32.xlu0 %v1753_v38 }
 0xd3c   : > { %v1755_v41 = vpop.xlane.xlu0 %1754 }
 0xd3d   : > { %v1756_v42 = vmul.f32 0.03125, %v1755_v41 }
 0xd3f   : > { %v1757_v43 = vadd.f32 1e-12, %v1756_v42 }
 0xd41   : > { %3459 = vrsqrt.f32 %v1757_v43 }
 0xd4b   : > { %v3460_v44 = vpop.eup %3459 }
 0xd4c   : > { %v1759_v46 = vmul.f32 %v3460_v44, %v1751_v36 }
 0xd4e   : > { %v1766_v48 = vmul.f32 %v3078_v45, %v1759_v46 }
 0xd50   : > { %v3901_v49 = vadd.f32 %v3079_v47, %v1766_v48 }
 0xd52   : > { %v1778_v50 = vpack.c.bf16 %v3901_v49, %v3901_v49 }
 0xd54   : > { %3293 = vmatmul.mubr.msk.bf16.vlgmr.msra.gmra.mrb[16].mxu0 %vm704_vm0, %v1778_v50 }
 0xd55   : > { %3298 = vmatprep.mubr.msk.f32.mxu0 %vm3532_vm1, %v3531_v8 }
 0xe27   : > { %v1841_v52 = vpop.f32.mrb[16].mxu0 }
 0xe28   : > { %v3911_v53 = vadd.f32 %v3086_v51, %v1841_v52  ;;  %v3294_v54 = vpop.f32.mrb[17].mxu0 }
 0xe29   : > { %v1844_v55 = vpop.f32.mrb[18].mxu0 }
 0xe2a   : > { %2013 = vrot.lane.b32.xlu1 %v3911_v53, %s3535_s28  ;;  %1848 = vrot.lane.b32.xlu0 %v3911_v53, %s3534_s27  ;;  %v3295_v56 = vpop.f32.mrb[19].mxu0  ;;  %s4128_s27 = smov 64   ;;  %s4129_s28 = smov 48   ;;  %v3429_v55 = vld [vmem:[%s4088_s10 + $0x10] sm:$0xff]  }
 0xe2b   : > { %v3430_v56 = vld [vmem:[%s4088_s10 + $0x18] sm:$0xff]  }
 0xe2e   : > { %2011 = vrot.lane.b32.xlu1 %v3911_v53, %s3536_s4  ;;  %2176 = vrot.lane.b32.xlu0 %v3911_v53, %s3538_s2  ;;  %s4130_s4 = smov 40   ;;  %s3080_s2 = sld [smem:[#allocation2 + $0x1]] }
 0xe32   : > { %2178 = vrot.lane.b32.xlu1 %v3911_v53, %s3537_s23  ;;  %2341 = vrot.lane.b32.xlu0 %v3911_v53, %s4126_s30  ;;  %s4131_s23 = smov 56   ;;  %s4134_s30 = smov 24  }
 0xe36   : > { %2343 = vrot.lane.b32.xlu1 %v3911_v53, %s4127_s26 }
 0xe9c   : > { %v2014_v57 = vpop.permute.xlu1 %2013  ;;  %v1849_v58 = vpop.permute.xlu0 %1848 }
 0xe9d   : > { %3297 = vmatpush3.xpose.msk.msra.mxu0 %vm813_vm2, %v1849_v58  ;;  %3307 = vmatpush3.xpose.msk.msra.mxu1 %vm813_vm2, %v2014_v57 }
 0xe9e   : > { %3316 = vmatprep.subr.mxu1 %v3531_v8  ;;  %3301 = vmatprep.subr.mxu0 %v3531_v8 }
 0xea0   : > { %v2012_v59 = vpop.permute.xlu1 %2011  ;;  %3299 = vmatmul.mubr.msk.f32.vlgmr.msra.gmra.mrb[20].mxu0 %vm813_vm2, %v3911_v53  ;;  %v2177_v61 = vpop.permute.xlu0 %2176 }
 0xea1   : > { %3309 = vmatmul.mubr.msk.f32.vlgmr.msra.gmra.mrb[16].mxu1 %vm813_vm2, %v2012_v59  ;;  %3303 = vmatprep.mubr.msk.f32.mxu0 %vm3532_vm1, %v3531_v8 }
 0xea2   : > { %3318 = vmatprep.mubr.msk.f32.mxu1 %vm3532_vm1, %v3531_v8 }
 0xea4   : > { %v2179_v60 = vpop.permute.xlu1 %2178  ;;  %v2342_v63 = vpop.permute.xlu0 %2341 }
 0xea5   : > { %3317 = vmatpush3.xpose.msk.msra.mxu1 %vm813_vm2, %v2179_v60 }
 0xea6   : > { %3326 = vmatprep.subr.mxu1 %v3531_v8 }
 0xea8   : > { %v2344_v62 = vpop.permute.xlu1 %2343  ;;  %3319 = vmatmul.mubr.msk.f32.vlgmr.msra.gmra.mrb[18].mxu1 %vm813_vm2, %v2177_v61 }
 0xea9   : > { %3327 = vmatpush3.xpose.msk.msra.mxu1 %vm813_vm2, %v2344_v62  ;;  %3328 = vmatprep.mubr.msk.f32.mxu1 %vm3532_vm1, %v3531_v8 }
 0xeaa   : > { %3336 = vmatprep.subr.bf16.mxu1 %v3531_v8 }
 0xeac   : > { %3329 = vmatmul.mubr.msk.f32.vlgmr.msra.gmra.mrb[20].mxu1 %vm813_vm2, %v2342_v63 }
 0xead   : > { %3340 = vmatprep.mubr.msk.bf16.mxu1 %vm3532_vm1, %v3531_v8  ;;  %3337 = vmatpush3.bf16.msra.mxu1 %v3429_v55 }
 0xeae   : > { %3338 = vmatprep.subr.bf16.mxu1 %v3531_v8 }
 0xeb1   : > { %3339 = vmatpush3.bf16.msra.mxu1 %v3430_v56  ;;  %v3133_v56 = vld [vmem:[%s4095_s17 + $0x1] ss:$0 sm:$0xff] }
 0xeb2   : > { %3352 = vmatprep.subr.bf16.mxu1 %v3531_v8 }
 0xf73   : > { %v1920_v0 = vpop.f32.mrb[20].mxu0 }
 0xf74   : > { %v1921_v1 = vadd.f32 %v3759_v28, %v1920_v0  ;;  %v3300_v2 = vpop.f32.mrb[21].mxu0  ;;  %v2085_v3 = vpop.f32.mrb[16].mxu1 }
 0xf75   : > { %v2086_v4 = vadd.f32 %v3759_v28, %v2085_v3  ;;  %v3310_v5 = vpop.f32.mrb[17].mxu1 }
 0xf76   : > { %v1924_v6 = vsel %vm813_vm2, %v1921_v1, -inf }
 0xf77   : > { %1925 = vmax.xlane.f32.xlu1 %v1924_v6  ;;  %v2089_v7 = vsel %vm813_vm2, %v2086_v4, -inf }
 0xf78   : > { %2090 = vmax.xlane.f32.xlu0 %v2089_v7 }
 0xf7b   : > { %v2250_v9 = vpop.f32.mrb[18].mxu1 }
 0xf7c   : > { %v2251_v10 = vadd.f32 %v3759_v28, %v2250_v9  ;;  %v3320_v11 = vpop.f32.mrb[19].mxu1  ;;  %v3107_v9 = vld [vmem:[%s4089_s11 + $0x1] ss:$0 sm:$0xff] }
 0xf7e   : > { %v2254_v12 = vsel %vm813_vm2, %v2251_v10, -inf }
 0xf7f   : > { %2255 = vmax.xlane.f32.xlu0 %v2254_v12  ;;  %v2415_v13 = vpop.f32.mrb[20].mxu1 }
 0xf80   : > { %v2416_v14 = vadd.f32 %v3759_v28, %v2415_v13  ;;  %v3330_v15 = vpop.f32.mrb[21].mxu1 }
 0xf82   : > { %v2419_v16 = vsel %vm813_vm2, %v2416_v14, -inf }
 0xf83   : > { %2420 = vmax.xlane.f32.xlu0 %v2419_v16 }
 0xf88   : > { %1935 = vrot.lane.b32.xlu1 %v3911_v53, %s4128_s27 }
0x1004   : > { %v1926_v17 = vpop.xlane.xlu1 %1925 }
0x1005   : > { %v1927_v19 = vsub.f32 %v1921_v1, %v1926_v17  ;;  %v2091_v20 = vpop.xlane.xlu0 %2090 }
0x1006   : > { %v2092_v21 = vsub.f32 %v2086_v4, %v2091_v20 }
0x1007   : > { %v1928_v22 = vmul.f32 1.442695, %v1927_v19 }
0x1008   : > { %v2093_v23 = vmul.f32 1.442695, %v2092_v21  ;;  %v1936_v24 = vpop.permute.xlu1 %1935 }
0x1009   : > { %3461 = vpow2.f32 %v1928_v22  ;;  %3302 = vmatpush3.msra.mxu0 %v1936_v24  ;;  %v3432_v24 = vld [vmem:[%s4092_s14 + $0x18] sm:$0xff]  }
0x100a   : > { %3463 = vpow2.f32 %v2093_v23  ;;  %3311 = vmatprep.subr.mxu0 %v3531_v8  ;;  %v3431_v23 = vld [vmem:[%s4092_s14 + $0x10] sm:$0xff]  }
0x100c   : > { %v2256_v28 = vpop.xlane.xlu0 %2255 }
0x100d   : > { %v2257_v25 = vsub.f32 %v2251_v10, %v2256_v28 }
0x100f   : > { %v2258_v26 = vmul.f32 1.442695, %v2257_v25 }
0x1010   : > { %v2421_v27 = vpop.xlane.xlu0 %2420 }
0x1011   : > { %3465 = vpow2.f32 %v2258_v26  ;;  %v2422_v29 = vsub.f32 %v2416_v14, %v2421_v27 }
0x1013   : > { %v3462_v30 = vpop.eup %3461  ;;  %v2423_v31 = vmul.f32 1.442695, %v2422_v29  ;;  %v3113_v29 = vld [vmem:[%s4090_s12 + $0x1] ss:$0 sm:$0xff] }
0x1014   : > { %v3464_v32 = vpop.eup %3463  ;;  %v1930_v33 = vsel %vm813_vm2, %v3462_v30, 0.0 }
0x1015   : > { %3467 = vpow2.f32 %v2423_v31  ;;  %1931 = vadd.xlane.f32.xlu1 %v1930_v33  ;;  %v2095_v34 = vsel %vm813_vm2, %v3464_v32, 0.0  ;;  %v3114_v31 = vld [vmem:[%s4091_s13 + $0x1] ss:$0 sm:$0xff] }
0x1016   : > { %2096 = vadd.xlane.f32.xlu0 %v2095_v34 }
0x101b   : > { %v3466_v35 = vpop.eup %3465 }
0x101c   : > { %v2260_v36 = vsel %vm813_vm2, %v3466_v35, 0.0 }
0x101d   : > { %2261 = vadd.xlane.f32.xlu1 %v2260_v36  ;;  %v3434_v36 = vld [vmem:[%s4094_s16 + $0x28] sm:$0xff]  }
0x101f   : > { %v3468_v37 = vpop.eup %3467 }
0x1020   : > { %v2425_v38 = vsel %vm813_vm2, %v3468_v37, 0.0 }
0x1021   : > { %2426 = vadd.xlane.f32.xlu0 %v2425_v38  ;;  %v3436_v38 = vld [vmem:[%s4094_s16 + $0x38] sm:$0xff]  }
0x102e   : > { %2265 = vrot.lane.b32.xlu1 %v3911_v53, %s4129_s28 }
0x1032   : > { %2430 = vrot.lane.b32.xlu1 %v3911_v53, %s4130_s4  ;;  %s4135_s4 = sld [smem:[#allocation12_spill]] }
0x1037   : > { %2100 = vrot.lane.b32.xlu0 %v3911_v53, %s4131_s23 }
0x10a2   : > { %v1932_v39 = vpop.xlane.xlu1 %1931 }
0x10a3   : > { %3469 = vrcp.f32 %v1932_v39  ;;  %v2097_v40 = vpop.xlane.xlu0 %2096  ;;  %v3120_v39 = vld [vmem:[%s4093_s15 + $0x1] ss:$0 sm:$0xff] }
0x10a4   : > { %3471 = vrcp.f32 %v2097_v40 }
0x10aa   : > { %v2262_v41 = vpop.xlane.xlu1 %2261 }
0x10ab   : > { %3473 = vrcp.f32 %v2262_v41 }
0x10ad   : > { %v3470_v42 = vpop.eup %3469 }
0x10ae   : > { %v1934_v43 = vmul.f32 %v3470_v42, %v3462_v30  ;;  %v2427_v44 = vpop.xlane.xlu0 %2426  ;;  %v3472_v45 = vpop.eup %3471 }
0x10af   : > { %3475 = vrcp.f32 %v2427_v44  ;;  %v2099_v46 = vmul.f32 %v3472_v45, %v3464_v32  ;;  %v2266_v47 = vpop.permute.xlu1 %2265 }
0x10b0   : > { %3304 = vmatmul.mubr.msk.f32.vlgmr.msra.gmra.mrb[22].mxu0 %vm813_vm2, %v1934_v43 }
0x10b1   : > { %3313 = vmatprep.mubr.msk.f32.mxu0 %vm3532_vm1, %v3531_v8 }
0x10b2   : > { %v2101_v48 = vpop.permute.xlu0 %2100 }
0x10b3   : > { %3312 = vmatpush3.msra.mxu0 %v2101_v48  ;;  %v2431_v52 = vpop.permute.xlu1 %2430 }
0x10b4   : > { %3314 = vmatmul.mubr.msk.f32.vlgmr.msra.gmra.mrb[24].mxu0 %vm813_vm2, %v2099_v46  ;;  %3321 = vmatprep.subr.mxu0 %v3531_v8 }
0x10b5   : > { %v3474_v50 = vpop.eup %3473  ;;  %3322 = vmatpush3.msra.mxu0 %v2266_v47  ;;  %3323 = vmatprep.mubr.msk.f32.mxu0 %vm3532_vm1, %v3531_v8 }
0x10b6   : > { %v2264_v51 = vmul.f32 %v3474_v50, %v3466_v35  ;;  %3331 = vmatprep.subr.mxu0 %v3531_v8  ;;  %v3433_v35 = vld [vmem:[%s4094_s16 + $0x20] sm:$0xff]  }
0x10b8   : > { %3324 = vmatmul.mubr.msk.f32.vlgmr.msra.gmra.mrb[26].mxu0 %vm813_vm2, %v2264_v51 }
0x10b9   : > { %v3476_v53 = vpop.eup %3475  ;;  %3332 = vmatpush3.msra.mxu0 %v2431_v52  ;;  %3333 = vmatprep.mubr.msk.f32.mxu0 %vm3532_vm1, %v3531_v8 }
0x10ba   : > { %v2429_v54 = vmul.f32 %v3476_v53, %v3468_v37  ;;  %3344 = vmatprep.subr.bf16.mxu0 %v3531_v8  ;;  %v3435_v37 = vld [vmem:[%s4094_s16 + $0x30] sm:$0xff]  }
0x10bc   : > { %3334 = vmatmul.mubr.msk.f32.vlgmr.msra.gmra.mrb[28].mxu0 %vm813_vm2, %v2429_v54 }
0x10bd   : > { %3348 = vmatprep.mubr.msk.bf16.mxu0 %vm3532_vm1, %v3531_v8  ;;  %3345 = vmatpush3.bf16.msra.mxu0 %v3431_v23 }
0x10be   : > { %3346 = vmatprep.subr.bf16.mxu0 %v3531_v8 }
0x10c1   : > { %3347 = vmatpush3.bf16.msra.mxu0 %v3432_v24 }
0x10c2   : > { %3364 = vmatprep.subr.mxu0 %v3531_v8 }
0x1183   : > { %v2007_v57 = vpop.f32.mrb[22].mxu0 }
0x1184   : > { %v3305_v58 = vpop.f32.mrb[23].mxu0 }
0x1187   : > { %v2172_v59 = vpop.f32.mrb[24].mxu0 }
0x1188   : > { %2507 = vrot.lane.b32.xlu1 %v2172_v59, %s4132_s29  ;;  %v3315_v60 = vpop.f32.mrb[25].mxu0 }
0x118b   : > { %v2337_v61 = vpop.f32.mrb[26].mxu0 }
0x118c   : > { %2511 = vrot.lane.b32.xlu0 %v2337_v61, %s4133_s0  ;;  %v3325_v62 = vpop.f32.mrb[27].mxu0  ;;  %s4048_s0 = sshll.u32 %s3700_s24, 2 }
0x118d   : > { %s695_s27 = scalar_lea.vmem %s4083_s5, %s4048_s0  ;;  %s691_s23 = scalar_lea.vmem %s4135_s4, %s4048_s0 }
0x118f   : > { %v2502_v63 = vpop.f32.mrb[28].mxu0 }
0x1190   : > { %2515 = vrot.lane.b32.xlu1 %v2502_v63, %s4134_s30  ;;  %v3335_v0 = vpop.f32.mrb[29].mxu0 }
0x1191   : > { %v3547_v0 = vmov 0  }
0x1192   : > { %3416 = vset.pattern.permute.xlu1 %v3547_v0  ;;  %3415 = vset.pattern.permute.xlu0 %v3547_v0 }
0x11fa   : > { %v2508_v1 = vpop.permute.xlu1 %2507 }
0x11fb   : > { %v2518_v3 = vsel %vm813_vm2, %v2007_v57, %v2508_v1  ;;  %v2830_v1 = vld [vmem:[%s695_s27] sm:$0x7]  ;;  %s3147_s27 = sshll.u32 %s3659_s22, 7 }
0x11fc   : > { %s2914_s24 = sld [smem:[#allocation4 + %s3147_s27]] }
0x11fe   : > { %v2512_v2 = vpop.permute.xlu0 %2511 }
0x11ff   : > { %v2519_v4 = vsel %vm1483_vm3, %v2518_v3, %v2512_v2 }
0x1202   : > { %v2516_v5 = vpop.permute.xlu1 %2515 }
0x1203   : > { %v2520_v6 = vsel %vm1485_vm4, %v2519_v4, %v2516_v5 }
0x1204   : > { %v2521_v7 = vpack.c.bf16 %v2520_v6, %v2520_v6 }
0x1206   : > { %3341 = vmatmul.mubr.msk.bf16.vlgmr.msra.gmra.mrb[24].mxu1 %vm704_vm0, %v2521_v7  ;;  %v2823_v7 = vld [vmem:[%s691_s23] sm:$0x7]  ;;  %s699_s23 = scalar_lea.vmem %s4098_s20, %s4048_s0 }
0x1207   : > { %3360 = vmatprep.mubr.msk.bf16.mxu1 %vm3532_vm1, %v3531_v8  ;;  %3353 = vmatpush3.bf16.msra.mxu1 %v3433_v35 }
0x1208   : > { %3354 = vmatprep.subr.bf16.mxu1 %v3531_v8 }
0x120b   : > { %3355 = vmatpush3.bf16.msra.mxu1 %v3434_v36 }
0x120c   : > { %3356 = vmatprep.subr.bf16.mxu1 %v3531_v8 }
0x120f   : > { %3357 = vmatpush3.bf16.msra.mxu1 %v3435_v37 }
0x1210   : > { %3358 = vmatprep.subr.bf16.mxu1 %v3531_v8 }
0x1213   : > { %3359 = vmatpush3.bf16.msra.mxu1 %v3436_v38 }
0x12d9   : > { %v2584_v10 = vpop.f32.mrb[24].mxu1 }
0x12da   : > { %v2585_v11 = vadd.f32 %v3107_v9, %v2584_v10  ;;  %v3342_v12 = vpop.f32.mrb[25].mxu1 }
0x12db   : > { %v2587_v13 = vpop.f32.mrb[26].mxu1  ;;  %v2821_v12 = vlaneseq }
0x12dc   : > { %v3343_v14 = vpop.f32.mrb[27].mxu1  ;;  %v2590_v15 = vadd.f32 %v2585_v11, %v3901_v49 }
0x12dd   : > { %v2822_v13 = vand.u32 127, %v2821_v12 }
0x12de   : > { %v2595_v16 = vsel %vm704_vm0, %v2590_v15, 0.0 }
0x12df   : > { %2596 = vadd.xlane.f32.xlu0 %v2595_v16 }
0x136c   : > { %v2597_v17 = vpop.xlane.xlu0 %2596 }
0x136d   : > { %v2598_v19 = vmul.f32 0.03125, %v2597_v17  ;;  %v1775_v17 = vstv %s3080_s2 }
0x136e   : > { %v1776_v23 = vmul.f32 %v1775_v17, %v3901_v49  ;;  %v2912_v49 = vshrl.u32 %v2821_v12, 7 }
0x136f   : > { %v2599_v20 = vsub.f32 %v2590_v15, %v2598_v19  ;;  %v3141_v19 = vld [vmem:[%s4096_s18 + $0x1] ss:$0 sm:$0xff] }
0x1371   : > { %v2600_v21 = vmul.f32 %v2599_v20, %v2599_v20 }
0x1373   : > { %v2601_v22 = vsel %vm704_vm0, %v2600_v21, 0.0  ;;  %v734_v21 = vstv %s733_s3 }
0x1374   : > { %2602 = vadd.xlane.f32.xlu1 %v2601_v22  ;;  %v3142_v22 = vld [vmem:[%s4097_s19 + $0x1] ss:$0 sm:$0xff] }
0x1385   : > { %2832 = vperm.xlu1 %3416, %v2830_v1  }
0x1401   : > { %v2603_v28 = vpop.xlane.xlu1 %2602 }
0x1402   : > { %v2604_v25 = vmul.f32 0.03125, %v2603_v28  ;;  %v2818_v28 = vstv %s3143_s25 }
0x1404   : > { %v2605_v26 = vadd.f32 1e-12, %v2604_v25  ;;  %v735_v25 = vmul.f32 %v734_v21, %v3728_v18 }
0x1405   : > { %v2833_v14 = vpop.permute.xlu1 %2832 }
0x1406   : > { %3477 = vrsqrt.f32 %v2605_v26  ;;  %vm2834_vm6 = vcmp.eq.s32.totalorder %v2822_v13, %v2833_v14 }
0x1410   : > { %v3478_v27 = vpop.eup %3477 }
0x1411   : > { %v2607_v30 = vmul.f32 %v3478_v27, %v2599_v20  ;;  %v3145_v27 = vsel %vm2834_vm6, 1.0, %v3531_v8 }
0x1413   : > { %v2614_v32 = vmul.f32 %v3113_v29, %v2607_v30  ;;  %v1777_v30 = vadd.f32 %v1776_v23, %v735_v25 }
0x1415   : > { %v2621_v33 = vadd.f32 %v3114_v31, %v2614_v32 }
0x1417   : > { %v2622_v34 = vpack.c.bf16 %v2621_v33, %v2621_v33 }
0x1419   : > { %3349 = vmatmul.mubr.msk.bf16.vlgmr.msra.gmra.mrb[32].mxu0 %vm704_vm0, %v2622_v34  ;;  %v2915_v34 = vstv %s2914_s24 }
0x141a   : > { %3366 = vmatprep.mubr.msk.f32.mxu0 %vm3532_vm1, %v3531_v8  ;;  %vm2916_vm8 = vcmp.lt.s32.totalorder %v2912_v49, %v2915_v34 }
0x14ec   : > { %v2685_v40 = vpop.f32.mrb[32].mxu0 }
0x14ed   : > { %v2686_v41 = vadd.f32 %v3120_v39, %v2685_v40  ;;  %v3350_v42 = vpop.f32.mrb[33].mxu0 }
0x14ee   : > { %v2688_v43 = vpop.f32.mrb[34].mxu0 }
0x14ef   : > { %v2691_v44 = vmul.f32 %v2686_v41, %v2686_v41  ;;  %v3351_v45 = vpop.f32.mrb[35].mxu0 }
0x14f1   : > { %v2692_v46 = vmul.f32 %v2691_v44, %v2686_v41 }
0x14f3   : > { %v2693_v47 = vmul.f32 0.044715, %v2692_v46 }
0x14f5   : > { %v2694_v48 = vadd.f32 %v2693_v47, %v2686_v41 }
0x14f7   : > { %v2695_v50 = vmul.f32 0.7978846, %v2694_v48 }
0x14f9   : > { %3479 = vtanh.f32 %v2695_v50 }
0x1503   : > { %v3480_v51 = vpop.eup %3479 }
0x1504   : > { %v2697_v52 = vadd.f32 1.0, %v3480_v51 }
0x1506   : > { %v2698_v53 = vmul.f32 0.5, %v2697_v52 }
0x1508   : > { %v2699_v54 = vmul.f32 %v2698_v53, %v2686_v41 }
0x150a   : > { %v2700_v55 = vpack.c.bf16 %v2699_v54, %v2699_v54 }
0x150c   : > { %3361 = vmatmul.mubr.msk.bf16.vlgmr.msra.gmra.mrb[28].mxu1 %vm1700_vm5, %v2700_v55 }
0x15df   : > { %v2779_v57 = vpop.f32.mrb[28].mxu1 }
0x15e0   : > { %v2780_v58 = vadd.f32 %v3133_v56, %v2779_v57  ;;  %v3362_v59 = vpop.f32.mrb[29].mxu1 }
0x15e1   : > { %v2782_v60 = vpop.f32.mrb[30].mxu1 }
0x15e2   : > { %v3363_v61 = vpop.f32.mrb[31].mxu1  ;;  %v2785_v62 = vadd.f32 %v2780_v58, %v2621_v33 }
0x15e4   : > { %v2790_v63 = vsel %vm704_vm0, %v2785_v62, 0.0 }
0x15e5   : > { %2791 = vadd.xlane.f32.xlu0 %v2790_v63 }
0x1672   : > { %v2792_v2 = vpop.xlane.xlu0 %2791 }
0x1673   : > { %v2793_v3 = vmul.f32 0.03125, %v2792_v2 }
0x1675   : > { %v2794_v4 = vsub.f32 %v2785_v62, %v2793_v3 }
0x1677   : > { %v2795_v5 = vmul.f32 %v2794_v4, %v2794_v4 }
0x1679   : > { %v2796_v6 = vsel %vm704_vm0, %v2795_v5, 0.0 }
0x167a   : > { %2797 = vadd.xlane.f32.xlu0 %v2796_v6 }
0x1690   : > { %2825 = vperm.xlu0 %3415, %v2823_v7  }
0x1707   : > { %v2798_v9 = vpop.xlane.xlu0 %2797 }
0x1708   : > { %v2799_v10 = vmul.f32 0.03125, %v2798_v9 }
0x170a   : > { %v2800_v11 = vadd.f32 1e-12, %v2799_v10 }
0x170c   : > { %3481 = vrsqrt.f32 %v2800_v11 }
0x170f   : > { %v2826_v15 = vpop.permute.xlu0 %2825 }
0x1710   : > { %vm2827_vm7 = vcmp.eq.s32.totalorder %v2822_v13, %v2826_v15 }
0x1711   : > { %v3144_v29 = vsel %vm2827_vm7, 1.0, %v3531_v8 }
0x1712   : > { %v2837_v32 = vadd.f32 %v3145_v27, %v3144_v29 }
0x1716   : > { %v3482_v16 = vpop.eup %3481 }
0x1717   : > { %v2802_v20 = vmul.f32 %v3482_v16, %v2794_v4 }
0x1719   : > { %v2809_v24 = vmul.f32 %v3141_v19, %v2802_v20 }
0x171b   : > { %v2816_v26 = vadd.f32 %v3142_v22, %v2809_v24 }
0x171d   : > { %v2819_v31 = vmul.f32 %v2818_v28, %v2816_v26 }
0x171f   : > { %v2820_v33 = vadd.f32 %v2819_v31, %v1777_v30 }
0x1721   : > { %3365 = vmatpush3.msra.mxu0 %v2820_v33 }
0x1722   : > { %3367 = vmatmul.mubr.msk.f32.vlgmr.msra.gmra.mrb[30].mxu0 %vm813_vm2, %v2837_v32 }
0x17f5   : > { %v2907_v18 = vpop.f32.mrb[30].mxu0 }
0x17f6   : > { %v2919_v35 = vsel %vm2916_vm8, %v2907_v18, 0.0  ;;  %v3368_v8 = vpop.f32.mrb[31].mxu0 }
0x17f7   : > { %2921 = vst.msk [vmem:[%s699_s23] sm:$0x7] %vm2920_vm9, %v2919_v35 }
0x17f8 PF: > { %s32_s1 = sadd.s32 1, %s3527_s1  }
0x17f9   : > { %p29_p5 = scmp.ge.s32.totalorder %s32_s1, 4  }
0x17fb   :  { %31 = sbr.rel (!%p29_p5) target bundleno = 8 (0x8), region = 160 }
0x1802   :  { %2941 = vsyncpa [#allocation3], 1 }
0x1803   :  { %2943 = vsyncpa [#allocation3 + $0x1], 1 }
0x1804   :  { %2944 = vsyncpa [#allocation5], 1 }

</bundles_post_ra>
